<compile_context>
chip_gen: v7x
topology: tpu7x:2x2x1
jax: 0.10.0
libtpu: 0.0.40
codegen_flags: <defaults>
</compile_context>

<pallas_src>
import functools

import jax
import jax.numpy as jnp
from jax.experimental import pallas as pl
from jax.experimental.pallas import tpu as pltpu

LN_EPS = 1e-5  # nn.LayerNorm default


def get_stack_num(input_len, target_seq_len, embed_dim=768):
    """Mirror of Embeddings1D.get_stack_num (embed_dim == 768 / roberta branch)."""
    assert embed_dim == 768
    for i in range(1, input_len + 1):
        if input_len % i == 0 and input_len // i <= target_seq_len:
            return i
    return input_len


def _round_up(v, m):
    return ((v + m - 1) // m) * m


def _embed1d_kernel(xp_ref, w_ref, pos_ref, prm_ref, o_ref):
    """Patch projection + bias + LayerNorm + positional add for one row tile.

    xp_ref : (1, TN, Kp) bf16   flattened patches for one (batch, row-tile)
    w_ref  : (Kp, E)     bf16   projection matrix (Conv1d weight reshaped)
    pos_ref: (TN, E)     f32    position embeddings for this row tile
    prm_ref: (8, E)      f32    row0 = conv bias, row1 = LN gamma, row2 = LN beta
    o_ref  : (1, TN, E)
    """
    # MXU matmul, bf16 operands, f32 accumulation.
    acc = jnp.dot(xp_ref[0], w_ref[...], preferred_element_type=jnp.float32)

    prm = prm_ref[...]
    bias = prm[0:1, :]
    gamma = prm[1:2, :]
    beta = prm[2:3, :]
    acc = acc + bias                                   # (TN, E) + (1, E)

    # LayerNorm over the embed dim via sum / sum-of-squares (single pass on acc).
    inv_e = 1.0 / acc.shape[-1]
    s1 = jnp.sum(acc, axis=-1, keepdims=True)
    s2 = jnp.sum(acc * acc, axis=-1, keepdims=True)
    mean = s1 * inv_e
    var = jnp.maximum(s2 * inv_e - mean * mean, 0.0)
    inv = jax.lax.rsqrt(var + LN_EPS)                  # EUP slot
    y = (acc - mean) * inv * gamma + beta

    o_ref[0] = (y + pos_ref[...]).astype(o_ref.dtype)


def embeddings1d_forward(x, conv_w, conv_b, ln_g, ln_b, pos_table, *,
                         stack, row_tile=512, out_dtype=jnp.float32):
    """x: (B, C, L) float32. Returns (B, L // stack, embed_dim) in out_dtype."""
    B, C, L = x.shape
    E = conv_w.shape[0]
    assert L % stack == 0, (L, stack)
    T = L // stack
    K = C * stack
    assert T + 2 <= pos_table.shape[0], "position table too small for seq len"

    # Row tile (multiple of 8 sublanes); pad T up to a multiple of it.
    tn = min(_round_up(row_tile, 8), _round_up(T, 8))
    t_pad = _round_up(T, tn)
    # Lane-align K: pad to a 128-multiple when that costs <= 2x, else to 8.
    kp = _round_up(K, 128) if _round_up(K, 128) <= 2 * K else _round_up(K, 8)

    # ---- glue: layout-only reshapes, casts, zero padding -------------------
    # xp[b, t, c*stack + k] = x[b, c, t*stack + k]
    xp = x.reshape(B, C, T, stack).transpose(0, 2, 1, 3).reshape(B, T, K)
    xp = jnp.pad(xp.astype(jnp.bfloat16), ((0, 0), (0, t_pad - T), (0, kp - K)))

    # Conv1d weight (E, C, stack) -> projection matrix (K, E), zero-padded rows.
    wm = conv_w.transpose(1, 2, 0).reshape(K, E).astype(jnp.bfloat16)
    wm = jnp.pad(wm, ((0, kp - K), (0, 0)))

    # Position ids are arange(2, T + 2)  (padding_idx = 1).
    pos = pos_table[2:T + 2].astype(jnp.float32)
    pos = jnp.pad(pos, ((0, t_pad - T), (0, 0)))

    # Packed small parameters: one (8, E) operand instead of three (1, E) ones.
    prm = jnp.zeros((8, E), jnp.float32)
    prm = prm.at[0].set(conv_b).at[1].set(ln_g).at[2].set(ln_b)

    grid = (B, t_pad // tn)
    n_rows = B * t_pad
    cost = pl.CostEstimate(
        flops=2 * n_rows * kp * E,
        transcendentals=0,
        bytes_accessed=int(xp.size * 2 + wm.size * 2 + pos.size * 4
                           + prm.size * 4 + n_rows * E * 4),
    )

    out = pl.pallas_call(
        _embed1d_kernel,
        out_shape=jax.ShapeDtypeStruct((B, t_pad, E), out_dtype),
        grid=grid,
        in_specs=[
            pl.BlockSpec((1, tn, kp), lambda b, t: (b, t, 0)),   # patches
            pl.BlockSpec((kp, E), lambda b, t: (0, 0)),          # projection
            pl.BlockSpec((tn, E), lambda b, t: (t, 0)),          # pos embeddings
            pl.BlockSpec((8, E), lambda b, t: (0, 0)),           # packed params
        ],
        out_specs=pl.BlockSpec((1, tn, E), lambda b, t: (b, t, 0)),
        compiler_params=pltpu.CompilerParams(
            dimension_semantics=("parallel", "parallel"),
            vmem_limit_bytes=32 * 1024 * 1024,
        ),
        cost_estimate=cost,
    )(xp, wm, pos, prm)

    return out[:, :T, :]


def reference(x, conv_w, conv_b, ln_g, ln_b, pos_table, stack):
    """Pure-JAX f32 reference of the same forward (for correctness check)."""
    B, C, L = x.shape
    T = L // stack
    xr = x.reshape(B, C, T, stack)
    y = jnp.einsum("bcts,ecs->bte", xr, conv_w) + conv_b        # Conv1d k=s=stack
    mean = jnp.mean(y, axis=-1, keepdims=True)
    var = jnp.mean((y - mean) ** 2, axis=-1, keepdims=True)
    y = (y - mean) / jnp.sqrt(var + LN_EPS) * ln_g + ln_b
    return y + pos_table[2:T + 2][None]


if __name__ == "__main__":
    # wrapper1D(input_shape=(B, C, L), weight='roberta', target_seq_len=130) with
    # output_raw=True  =>  Embeddings1D with embed_dim=768 (fixed by the module).
    B, C, L = 2, 4, 2048
    TARGET_SEQ_LEN = 130
    EMBED_DIM = 768

    stack = get_stack_num(L, TARGET_SEQ_LEN)      # -> 16
    T = L // stack                                # -> 128 patches

    key = jax.random.PRNGKey(0)
    kx, kw, kb, kg, kbe, kp = jax.random.split(key, 6)
    x = jax.random.normal(kx, (B, C, L), dtype=jnp.float32)
    conv_w = 0.02 * jax.random.normal(kw, (EMBED_DIM, C, stack), dtype=jnp.float32)
    conv_b = 0.01 * jax.random.normal(kb, (EMBED_DIM,), dtype=jnp.float32)
    ln_g = 1.0 + 0.01 * jax.random.normal(kg, (EMBED_DIM,), dtype=jnp.float32)
    ln_b = 0.01 * jax.random.normal(kbe, (EMBED_DIM,), dtype=jnp.float32)
    pos_table = 0.02 * jax.random.normal(kp, (TARGET_SEQ_LEN, EMBED_DIM),
                                         dtype=jnp.float32)
    pos_table = pos_table.at[1].set(0.0)          # nn.Embedding padding_idx=1 row

    # row_tile=64 exercises a multi-tile grid at these demo shapes; use ~512 for
    # production-sized inputs (fits the VMEM budget on v5e/v6e/v7x).
    fwd = jax.jit(functools.partial(embeddings1d_forward, stack=stack, row_tile=64))
    out = jax.block_until_ready(fwd(x, conv_w, conv_b, ln_g, ln_b, pos_table))

    ref = jax.block_until_ready(
        reference(x, conv_w, conv_b, ln_g, ln_b, pos_table, stack))

    assert out.shape == (B, T, EMBED_DIM), out.shape
    err = float(jnp.max(jnp.abs(out - ref)))
    # bf16 matmul operands (f32 accumulation / LN) => small error vs f32 reference.
    assert jnp.allclose(out, ref, atol=3e-2, rtol=3e-2), err

    print("KERNEL_OK")
</pallas_src>

<mosaic_0001>
module attributes {stable_mosaic.version = 11 : i64} {
  func.func @_embed1d_kernel(%arg0: i32, %arg1: i32, %arg2: memref<1x64x128xbf16, #tpu.memory_space<vmem>>, %arg3: memref<128x768xbf16, #tpu.memory_space<vmem>>, %arg4: memref<64x768xf32, #tpu.memory_space<vmem>>, %arg5: memref<8x768xf32, #tpu.memory_space<vmem>>, %arg6: memref<1x64x768xf32, #tpu.memory_space<vmem>>) attributes {dimension_semantics = [#tpu.dimension_semantics<parallel>, #tpu.dimension_semantics<parallel>], iteration_bounds = array<i64: 2, 2>, scalar_prefetch = 0 : i64, scratch_operands = 0 : i64, tpu.core_type = #tpu.core_type<tc>, window_params = [{transform_indices = @transform_0, window_bounds = array<i64: 1, 64, 128>}, {pipeline_mode = #tpu.pipeline_mode<synchronous>, transform_indices = @transform_1, window_bounds = array<i64: 128, 768>}, {transform_indices = @transform_2, window_bounds = array<i64: 64, 768>}, {pipeline_mode = #tpu.pipeline_mode<synchronous>, transform_indices = @transform_3, window_bounds = array<i64: 8, 768>}, {transform_indices = @transform_4, window_bounds = array<i64: 1, 64, 768>}]} {
    %c0 = arith.constant 0 : index
    %c0_0 = arith.constant 0 : index
    %c0_1 = arith.constant 0 : index
    %0 = vector.load %arg2[%c0, %c0_0, %c0_1] : memref<1x64x128xbf16, #tpu.memory_space<vmem>>, vector<1x64x128xbf16>
    %1 = vector.shape_cast %0 : vector<1x64x128xbf16> to vector<64x128xbf16>
    %c0_2 = arith.constant 0 : index
    %c0_3 = arith.constant 0 : index
    %2 = vector.load %arg3[%c0_2, %c0_3] : memref<128x768xbf16, #tpu.memory_space<vmem>>, vector<128x768xbf16>
    %cst = arith.constant dense<0.000000e+00> : vector<64x768xf32>
    %3 = tpu.matmul %1, %2, %cst {dimension_numbers = #tpu.dot_dimension_numbers<[1], [0], [0], [1], [0, 0, 1, 1], [], []>} : vector<64x128xbf16>, vector<128x768xbf16>, vector<64x768xf32> -> vector<64x768xf32>
    %c0_4 = arith.constant 0 : index
    %c0_5 = arith.constant 0 : index
    %4 = vector.load %arg5[%c0_4, %c0_5] : memref<8x768xf32, #tpu.memory_space<vmem>>, vector<8x768xf32>
    %5 = vector.extract_strided_slice %4 {offsets = [0, 0], sizes = [1, 768], strides = [1, 1]} : vector<8x768xf32> to vector<1x768xf32>
    %6 = vector.extract_strided_slice %4 {offsets = [1, 0], sizes = [1, 768], strides = [1, 1]} : vector<8x768xf32> to vector<1x768xf32>
    %7 = vector.extract_strided_slice %4 {offsets = [2, 0], sizes = [1, 768], strides = [1, 1]} : vector<8x768xf32> to vector<1x768xf32>
    %8 = vector.broadcast %5 : vector<1x768xf32> to vector<64x768xf32>
    %9 = arith.addf %3, %8 : vector<64x768xf32>
    %cst_6 = arith.constant dense<0.000000e+00> : vector<64xf32>
    %10 = vector.multi_reduction <add>, %9, %cst_6 [1] : vector<64x768xf32> to vector<64xf32>
    %11 = vector.shape_cast %10 : vector<64xf32> to vector<64x1xf32>
    %12 = arith.mulf %9, %9 : vector<64x768xf32>
    %cst_7 = arith.constant dense<0.000000e+00> : vector<64xf32>
    %13 = vector.multi_reduction <add>, %12, %cst_7 [1] : vector<64x768xf32> to vector<64xf32>
    %14 = vector.shape_cast %13 : vector<64xf32> to vector<64x1xf32>
    %cst_8 = arith.constant 0.00130208337 : f32
    %15 = vector.broadcast %cst_8 : f32 to vector<64x1xf32>
    %16 = arith.mulf %11, %15 : vector<64x1xf32>
    %cst_9 = arith.constant 0.00130208337 : f32
    %17 = vector.broadcast %cst_9 : f32 to vector<64x1xf32>
    %18 = arith.mulf %14, %17 : vector<64x1xf32>
    %19 = arith.mulf %16, %16 : vector<64x1xf32>
    %20 = arith.subf %18, %19 : vector<64x1xf32>
    %cst_10 = arith.constant 0.000000e+00 : f32
    %21 = vector.broadcast %cst_10 : f32 to vector<64x1xf32>
    %22 = arith.maximumf %20, %21 : vector<64x1xf32>
    %cst_11 = arith.constant 9.99999974E-6 : f32
    %23 = vector.broadcast %cst_11 : f32 to vector<64x1xf32>
    %24 = arith.addf %22, %23 : vector<64x1xf32>
    %25 = math.rsqrt %24 : vector<64x1xf32>
    %26 = vector.broadcast %16 : vector<64x1xf32> to vector<64x768xf32>
    %27 = arith.subf %9, %26 : vector<64x768xf32>
    %28 = vector.broadcast %25 : vector<64x1xf32> to vector<64x768xf32>
    %29 = arith.mulf %27, %28 : vector<64x768xf32>
    %30 = vector.broadcast %6 : vector<1x768xf32> to vector<64x768xf32>
    %31 = arith.mulf %29, %30 : vector<64x768xf32>
    %32 = vector.broadcast %7 : vector<1x768xf32> to vector<64x768xf32>
    %33 = arith.addf %31, %32 : vector<64x768xf32>
    %c0_12 = arith.constant 0 : index
    %c0_13 = arith.constant 0 : index
    %34 = vector.load %arg4[%c0_12, %c0_13] : memref<64x768xf32, #tpu.memory_space<vmem>>, vector<64x768xf32>
    %35 = arith.addf %33, %34 : vector<64x768xf32>
    %c0_14 = arith.constant 0 : index
    %c0_15 = arith.constant 0 : index
    %c0_16 = arith.constant 0 : index
    %36 = vector.load %arg6[%c0_14, %c0_15, %c0_16] : memref<1x64x768xf32, #tpu.memory_space<vmem>>, vector<1x64x768xf32>
    %37 = vector.shape_cast %36 : vector<1x64x768xf32> to vector<64x768xf32>
    %38 = vector.shape_cast %35 : vector<64x768xf32> to vector<1x64x768xf32>
    tpu.vector_store %arg6[%c0_14, %c0_15, %c0_16], %38 {strides = array<i32>} : memref<1x64x768xf32, #tpu.memory_space<vmem>>, vector<1x64x768xf32>,
    return
  }
  func.func @transform_0(%arg0: i32, %arg1: i32) -> (i32, i32, i32) {
    %c0_i32 = arith.constant 0 : i32
    %c0_i32_0 = arith.constant 0 : i32
    return %arg0, %arg1, %c0_i32 : i32, i32, i32
  }
  func.func @transform_1(%arg0: i32, %arg1: i32) -> (i32, i32) {
    %c0_i32 = arith.constant 0 : i32
    %c0_i32_0 = arith.constant 0 : i32
    %c0_i32_1 = arith.constant 0 : i32
    return %c0_i32, %c0_i32_0 : i32, i32
  }
  func.func @transform_2(%arg0: i32, %arg1: i32) -> (i32, i32) {
    %c0_i32 = arith.constant 0 : i32
    %c0_i32_0 = arith.constant 0 : i32
    return %arg1, %c0_i32 : i32, i32
  }
  func.func @transform_3(%arg0: i32, %arg1: i32) -> (i32, i32) {
    %c0_i32 = arith.constant 0 : i32
    %c0_i32_0 = arith.constant 0 : i32
    %c0_i32_1 = arith.constant 0 : i32
    return %c0_i32, %c0_i32_0 : i32, i32
  }
  func.func @transform_4(%arg0: i32, %arg1: i32) -> (i32, i32, i32) {
    %c0_i32 = arith.constant 0 : i32
    %c0_i32_0 = arith.constant 0 : i32
    return %arg0, %arg1, %c0_i32 : i32, i32, i32
  }
}

</mosaic_0001>

<bundles_post_ra>
// kernel: embeddings1d_forward.1
= control target key start
LH: loop header
LB: loop body
LE: loop exit
PB: predicated region body
PF: predicated region fallthrough
CT: control target
= control target key end

     0   :  { %9 = vsyncpa [#allocation3], 0  ;;  %s3079_s0 = inlined_call_operand.vmem [shape: bf16[2,128,128], index: 0, kind: input, shape index: {}]   ;;  %s3080_s1 = inlined_call_operand.vmem [shape: bf16[128,768], index: 1, kind: input, shape index: {}]   ;;  %s3081_s2 = inlined_call_operand.vmem [shape: f32[128,768], index: 2, kind: input, shape index: {}]   ;;  %s3082_s3 = inlined_call_operand.vmem [shape: f32[8,768], index: 3, kind: input, shape index: {}]   ;;  %s3083_s4 = inlined_call_operand.hbm [shape: f32[2,128,768], index: 4, kind: output, shape index: {}]  }
   0x1   :  { %11 = vsyncpa [#allocation3 + $0x1], 0  ;;  %s1911_s15 = smov 0   ;;  %s1913_s16 = smov 0  }
   0x2   :  { %s1915_s17 = smov 0   ;;  %s1917_s18 = smov 0  }
   0x3   :  { %s1919_s19 = smov 0   ;;  %s1921_s20 = smov 0  }
   0x4   :  { %s1923_s21 = smov 0   ;;  %s1925_s22 = smov 0  }
   0x5 LB: > { %s1533_s23 = sadd.s32 4294967295, %s1880_s22   ;;  %s1534_s24 = sadd.s32 4294967294, %s1880_s22   ;;  %s1880_s22 = sphi %s1925_s22, %s17_s22   ;;  %s1876_s21 = sphi %s1923_s21, %s3251_s21   ;;  %s1872_s20 = sphi %s1921_s20, %s3250_s20   ;;  %s1868_s19 = sphi %s1919_s19, %s3249_s19   ;;  %s1864_s18 = sphi %s1917_s18, %s3248_s18   ;;  %s1860_s17 = sphi %s1915_s17, %s3247_s17   ;;  %s1856_s16 = sphi %s1913_s16, %s3246_s16   ;;  %s1852_s15 = sphi %s1911_s15, %s3245_s15  }
   0x6   : > { %s26_s25 = sadd.s32 1, %s1872_s20  ;;  %s29_s26 = sadd.s32 1, %s1876_s21 }
   0x7   : > { %p27_p0 = scmp.ge.s32.totalorder %s26_s25, 2  ;;  %p144_p1 = scmp.ne.s32.totalorder %s1860_s17, %s1856_s16 }
   0x8   : > { %p145_p2 = scmp.eq.s32.totalorder %s1533_s23, 3  ;;  %p150_p5 = scmp.ne.s32.totalorder %s1856_s16, %s1852_s15 }
   0x9   : > { %s3253_s25 = smov (%p27_p0, %s26_s25), 0  ;;  %s3255_s26 = smov (!%p27_p0, %s29_s26), %s1876_s21 }
   0xa   : > { %s130_s27 = ssub.s32 %s1872_s20, %s3253_s25  ;;  %p1962_p3 = por %p145_p2, %p144_p1 }
   0xb   : > { %p31_p4 = scmp.ge.s32.totalorder %s3255_s26, 2  ;;  %p151_p6 = scmp.eq.s32.totalorder %s1534_s24, 3 }
   0xc   : > { %p1537_p7 = scmp.ge.s32.totalorder %s1880_s22, 1  ;;  %p198_p9 = scmp.lt.s32.totalorder %s1880_s22, 5 }
   0xd   : > { %s3257_s26 = smov (%p31_p4, %s3255_s26), 0  ;;  %p1971_p8 = por %p151_p6, %p150_p5 }
   0xe   : > { %s129_s30 = ssub.s32 %s1876_s21, %s3257_s26  ;;  %s134_s5 = sadd.s32 1, %s1860_s17 }
   0xf   : > { %s131_s6 = sor.u32 %s130_s27, %s129_s30  ;;  %p199_p10 = pnand %p1537_p7, %p198_p9 }
  0x10   : > { %p132_p11 = scmp.eq.s32.totalorder %s131_s6, 0 }
  0x11   : > { %202 = sbr.rel (%p199_p10) target bundleno = 566 (0x236), region = 36 }
  0x12   : > { %s1980_s7 = scalar_select %p132_p11, %s1860_s17, %s134_s5  }
  0x18   : > { %v1694_v0 = vld [vmem:[%s3080_s1 + $0x4] ss:$24 sps:$4 sm:$0xff]   ;;  %v1882_v2 = vmov 0   ;;  %s1538_s12 = sshll.u32 %s1864_s18, 3  ;;  %v1698_v3 = vld [vmem:[%s3080_s1] ss:$24 sps:$4 sm:$0xff]   ;;  %v315_v53 = vlaneseq }
  0x19   : > { %v1696_v1 = vld [vmem:[%s3080_s1 + $0xc] ss:$24 sps:$4 sm:$0xff]   ;;  %635 = vmatprep.mubr.bf16.mxu0 %v1882_v2  ;;  %708 = vmatprep.mubr.bf16.mxu1 %v1882_v2  ;;  %v1699_v4 = vld [vmem:[%s3080_s1 + $0x8] ss:$24 sps:$4 sm:$0xff]   ;;  %p235_p12 = scmp.lt.s32.totalorder %s1868_s19, 1  ;;  %p237_p13 = scmp.lt.s32.totalorder %s1538_s12, 15 }
  0x1a   : > { %603 = vmatprep.subr.bf16.mxu0 %v1694_v0  ;;  %676 = vmatprep.subr.bf16.mxu1 %v1696_v1  ;;  %v1700_v5 = vld [vmem:[%s3080_s1 + $0x34] ss:$24 sps:$4 sm:$0xff]   ;;  %v1704_v7 = vld [vmem:[%s3080_s1 + $0x30] ss:$24 sps:$4 sm:$0xff]   ;;  %v1706_v9 = vld [vmem:[%s3080_s1 + $0x64] ss:$24 sps:$4 sm:$0xff]  }
  0x1b   : > { %604 = vmatpush1.bf16.msra.mxu0 %v1698_v3  ;;  %677 = vmatpush1.bf16.msra.mxu1 %v1699_v4  ;;  %v1702_v6 = vld [vmem:[%s3080_s1 + $0x3c] ss:$24 sps:$4 sm:$0xff]   ;;  %v1705_v8 = vld [vmem:[%s3080_s1 + $0x38] ss:$24 sps:$4 sm:$0xff]   ;;  %s236_s23 = scalar_select %p235_p12, %s1868_s19, 1  ;;  %v2158_v56 = vshrl.u32 %v315_v53, 7 }
  0x1c   : > { %605 = vmatprep.subr.bf16.mxu0 %v1700_v5  ;;  %678 = vmatprep.subr.bf16.mxu1 %v1702_v6  ;;  %v1708_v10 = vld [vmem:[%s3080_s1 + $0x6c] ss:$24 sps:$4 sm:$0xff]   ;;  %v1710_v11 = vld [vmem:[%s3080_s1 + $0x60] ss:$24 sps:$4 sm:$0xff]   ;;  %v1714_v14 = vld [vmem:[%s3080_s1 + $0x9c] ss:$24 sps:$4 sm:$0xff]  }
  0x1d   : > { %v1711_v12 = vld [vmem:[%s3080_s1 + $0x68] ss:$24 sps:$4 sm:$0xff]   ;;  %v1712_v13 = vld [vmem:[%s3080_s1 + $0x94] ss:$24 sps:$4 sm:$0xff]   ;;  %s3259_s12 = smov (!%p237_p13, %s1538_s12), 15  ;;  %s1539_s27 = sshll.u32 %s236_s23, 4 }
  0x1e   : > { %v1716_v15 = vld [vmem:[%s3080_s1 + $0x90] ss:$24 sps:$4 sm:$0xff]   ;;  %v1718_v17 = vld [vmem:[%s3080_s1 + $0xc4] ss:$24 sps:$4 sm:$0xff]   ;;  %s240_s11 = sadd.s32 %s1539_s27, %s3259_s12  ;;  %v1722_v19 = vld [vmem:[%s3080_s1 + $0xc0] ss:$24 sps:$4 sm:$0xff]  }
  0x1f   : > { %606 = vmatpush1.bf16.msra.mxu0 %v1704_v7  ;;  %679 = vmatpush1.bf16.msra.mxu1 %v1705_v8  ;;  %v1717_v16 = vld [vmem:[%s3080_s1 + $0x98] ss:$24 sps:$4 sm:$0xff]   ;;  %v1720_v18 = vld [vmem:[%s3080_s1 + $0xcc] ss:$24 sps:$4 sm:$0xff]   ;;  %v1723_v20 = vld [vmem:[%s3080_s1 + $0xc8] ss:$24 sps:$4 sm:$0xff]  }
  0x20   : > { %607 = vmatprep.subr.bf16.mxu0 %v1706_v9  ;;  %680 = vmatprep.subr.bf16.mxu1 %v1708_v10  ;;  %v1724_v21 = vld [vmem:[%s3080_s1 + $0xf4] ss:$24 sps:$4 sm:$0xff]   ;;  %s1540_s27 = sshll.u32 %s240_s11, 2  ;;  %v1728_v23 = vld [vmem:[%s3080_s1 + $0xf0] ss:$24 sps:$4 sm:$0xff]   ;;  %v317_v63 = vsub.s32 0, %v2158_v56 }
  0x21   : > { %v1726_v22 = vld [vmem:[%s3080_s1 + $0xfc] ss:$24 sps:$4 sm:$0xff]   ;;  %v1729_v24 = vld [vmem:[%s3080_s1 + $0xf8] ss:$24 sps:$4 sm:$0xff]   ;;  %s2068_s6 = scalar_lea.vmem %s3079_s0, %s1540_s27  ;;  %v1732_v26 = vld [vmem:[%s3080_s1 + $0x12c] ss:$24 sps:$4 sm:$0xff]  }
  0x22   : > { %v1730_v25 = vld [vmem:[%s3080_s1 + $0x124] ss:$24 sps:$4 sm:$0xff]   ;;  %v1734_v27 = vld [vmem:[%s3080_s1 + $0x120] ss:$24 sps:$4 sm:$0xff]   ;;  %v1736_v29 = vld [vmem:[%s3080_s1 + $0x154] ss:$24 sps:$4 sm:$0xff]  }
  0x23   : > { %608 = vmatpush1.bf16.msra.mxu0 %v1710_v11  ;;  %681 = vmatpush1.bf16.msra.mxu1 %v1711_v12  ;;  %v1735_v28 = vld [vmem:[%s3080_s1 + $0x128] ss:$24 sps:$4 sm:$0xff]   ;;  %v1738_v30 = vld [vmem:[%s3080_s1 + $0x15c] ss:$24 sps:$4 sm:$0xff]   ;;  %v1741_v32 = vld [vmem:[%s3080_s1 + $0x158] ss:$24 sps:$4 sm:$0xff]  }
  0x24   : > { %609 = vmatprep.subr.bf16.mxu0 %v1712_v13  ;;  %682 = vmatprep.subr.bf16.mxu1 %v1714_v14  ;;  %v1740_v31 = vld [vmem:[%s3080_s1 + $0x150] ss:$24 sps:$4 sm:$0xff]   ;;  %v1745_v33 = vld [vmem:[%s3080_s1 + $0x14] ss:$24 sps:$4 sm:$0xff]   ;;  %v2095_v34 = vld [vmem:[%s2068_s6] sm:$0xff]   ;;  %s1618_s27 = smul.u32 48, %s1864_s18 }
  0x25   : > { %v1743_v35 = vld [vmem:[%s3080_s1 + $0x10] ss:$24 sps:$4 sm:$0xff]   ;;  %v1748_v36 = vld [vmem:[%s3080_s1 + $0x44] ss:$24 sps:$4 sm:$0xff]   ;;  %v1746_v37 = vld [vmem:[%s3080_s1 + $0x40] ss:$24 sps:$4 sm:$0xff]  }
  0x26   : > { %v1752_v38 = vld [vmem:[%s3080_s1 + $0x74] ss:$24 sps:$4 sm:$0xff]   ;;  %v1750_v40 = vld [vmem:[%s3080_s1 + $0x70] ss:$24 sps:$4 sm:$0xff]   ;;  %v1755_v41 = vld [vmem:[%s3080_s1 + $0xa4] ss:$24 sps:$4 sm:$0xff]  }
  0x27   : > { %610 = vmatpush1.bf16.msra.mxu0 %v1716_v15  ;;  %683 = vmatpush1.bf16.msra.mxu1 %v1717_v16  ;;  %v1749_v39 = vld [vmem:[%s2068_s6 + $0x8] sm:$0xff]   ;;  %v1753_v42 = vld [vmem:[%s3080_s1 + $0xa0] ss:$24 sps:$4 sm:$0xff]   ;;  %v1756_v44 = vld [vmem:[%s2068_s6 + $0x10] sm:$0xff]   ;;  %s1619_s24 = smul.u32 96, %s1868_s19  ;;  %s1883_s10 = smov [#allocation2]  }
  0x28   : > { %611 = vmatprep.subr.bf16.mxu0 %v1718_v17  ;;  %684 = vmatprep.subr.bf16.mxu1 %v1720_v18  ;;  %v1759_v43 = vld [vmem:[%s3080_s1 + $0xd4] ss:$24 sps:$4 sm:$0xff]   ;;  %v1757_v45 = vld [vmem:[%s3080_s1 + $0xd0] ss:$24 sps:$4 sm:$0xff]   ;;  %v1762_v46 = vld [vmem:[%s3080_s1 + $0x104] ss:$24 sps:$4 sm:$0xff]  }
  0x29   : > { %v1760_v47 = vld [vmem:[%s3080_s1 + $0x100] ss:$24 sps:$4 sm:$0xff]   ;;  %v1766_v48 = vld [vmem:[%s3080_s1 + $0x134] ss:$24 sps:$4 sm:$0xff]   ;;  %v1764_v50 = vld [vmem:[%s3080_s1 + $0x130] ss:$24 sps:$4 sm:$0xff]   ;;  %s2978_s19 = sadd.s32 %s1619_s24, %s1618_s27 }
  0x2a   : > { %v1763_v49 = vld [vmem:[%s2068_s6 + $0x18] sm:$0xff]   ;;  %v2164_v0 = vld [vmem:[%s3082_s3] sm:$0xff]  ;;  %v2169_v1 = vld [vmem:[%s3082_s3 + $0x8] sm:$0xff]  ;;  %s1617_s6 = smul.u32 48, %s3259_s12  ;;  %s231_s12 = sand.u32 1, %s1856_s16  }
  0x2b   : > { %612 = vmatpush1.bf16.msra.mxu0 %v1722_v19  ;;  %685 = vmatpush1.bf16.msra.mxu1 %v1723_v20  ;;  %v1769_v51 = vld [vmem:[%s3080_s1 + $0x164] ss:$24 sps:$4 sm:$0xff]   ;;  %v1767_v52 = vld [vmem:[%s3080_s1 + $0x160] ss:$24 sps:$4 sm:$0xff]   ;;  %v2172_v4 = vrot.slane %v2164_v0, %v317_v63  ;;  %v2175_v5 = vrot.slane %v2169_v1, %v317_v63  ;;  %v2180_v10 = vld [vmem:[%s3082_s3 + $0x10] sm:$0xff]  ;;  %s2685_s14 = smul.u32 384, %s231_s12 }
  0x2c   : > { %613 = vmatprep.subr.bf16.mxu0 %v1724_v21  ;;  %686 = vmatprep.subr.bf16.mxu1 %v1726_v22  ;;  %v2185_v11 = vld [vmem:[%s3082_s3 + $0x18] sm:$0xff]  ;;  %v2196_v16 = vrot.slane %v2180_v10, %v317_v63  ;;  %s2681_s13 = scalar_lea.vmem %s3081_s2, %s1617_s6  ;;  %s1597_s18 = sshll.u32 %s2978_s19, 7 }
  0x2d   : > { %v2199_v17 = vrot.slane %v2185_v11, %v317_v63  ;;  %s2716_s23 = scalar_lea.vmem [#allocation2], %s2685_s14  ;;  %s3015_s8 = scalar_lea.hbm %s3083_s4, %s1597_s18 }
  0x2e   : > { %s1439_s30 = sshll.u32 %s2716_s23, 4  ;;  %s3027_s6 = scalar_lea.sflag [#allocation3], %s231_s12  ;;  %s3017_s30 = int_to_ptr.vmem [resolvable:$true] %s1439_s30 }
  0x2f   : > { %614 = vmatpush1.bf16.msra.mxu0 %v1728_v23  ;;  %687 = vmatpush1.bf16.msra.mxu1 %v1729_v24  ;;  %s1786_s9 = scalar_lea.vmem %s3017_s30, 6144 }
  0x30   : > { %615 = vmatprep.subr.bf16.mxu0 %v1730_v25  ;;  %688 = vmatprep.subr.bf16.mxu1 %v1732_v26  ;;  %p1787_p0 = scmp.ne.s32.totalorder %s3017_s30, %s1786_s9 }
  0x32   : > { %p1788_p1 = pnand %p1787_p0, %p1962_p3 }
  0x33   : > { %616 = vmatpush1.bf16.msra.mxu0 %v1734_v27  ;;  %689 = vmatpush1.bf16.msra.mxu1 %v1735_v28  ;;  %v2220_v27 = vld [vmem:[%s3082_s3 + $0x20] sm:$0xff] }
  0x34   : > { %617 = vmatprep.subr.bf16.mxu0 %v1736_v29  ;;  %690 = vmatprep.subr.bf16.mxu1 %v1738_v30  ;;  %p1789_p2 = pneg %p1788_p1 }
  0x37   : > { %618 = vmatpush1.bf16.msra.mxu0 %v1740_v31  ;;  %691 = vmatpush1.bf16.msra.mxu1 %v1741_v32 }
  0x38   : > { %749 = vmatprep.subr.bf16.mxu0 %v1745_v33  ;;  %1600 = vmatprep.subr.bf16.mxu1 %v1745_v33 }
  0x3a   : > { %636 = vmatmul.mubr.bf16.vlgmr.msra.gmra.mrb[0].mxu0 %v2095_v34  ;;  %709 = vmatmul.mubr.bf16.vlgmr.msra.gmra.mrb[0].mxu1 %v2095_v34 }
  0x3b   : > { %750 = vmatpush1.bf16.msra.mxu0 %v1743_v35  ;;  %1608 = vmatpush1.bf16.msra.mxu1 %v1743_v35 }
  0x3c   : > { %751 = vmatprep.subr.bf16.mxu0 %v1748_v36  ;;  %1601 = vmatprep.subr.bf16.mxu1 %v1748_v36 }
  0x3d   : > { %645 = vmatprep.mubr.bf16.mxu0 %v1882_v2  ;;  %718 = vmatprep.mubr.bf16.mxu1 %v1882_v2 }
  0x3f   : > { %752 = vmatpush1.bf16.msra.mxu0 %v1746_v37  ;;  %1609 = vmatpush1.bf16.msra.mxu1 %v1746_v37 }
  0x40   : > { %753 = vmatprep.subr.bf16.mxu0 %v1752_v38  ;;  %1602 = vmatprep.subr.bf16.mxu1 %v1752_v38 }
  0x42   : > { %646 = vmatmul.mubr.bf16.gmra.mrb[4].mxu0 %v1749_v39  ;;  %719 = vmatmul.mubr.bf16.gmra.mrb[4].mxu1 %v1749_v39 }
  0x43   : > { %754 = vmatpush1.bf16.msra.mxu0 %v1750_v40  ;;  %1610 = vmatpush1.bf16.msra.mxu1 %v1750_v40 }
  0x44   : > { %755 = vmatprep.subr.bf16.mxu0 %v1755_v41  ;;  %1603 = vmatprep.subr.bf16.mxu1 %v1755_v41 }
  0x45   : > { %655 = vmatprep.mubr.bf16.mxu0 %v1882_v2  ;;  %728 = vmatprep.mubr.bf16.mxu1 %v1882_v2 }
  0x47   : > { %756 = vmatpush1.bf16.msra.mxu0 %v1753_v42  ;;  %1611 = vmatpush1.bf16.msra.mxu1 %v1753_v42 }
  0x48   : > { %757 = vmatprep.subr.bf16.mxu0 %v1759_v43  ;;  %1604 = vmatprep.subr.bf16.mxu1 %v1759_v43 }
  0x4a   : > { %656 = vmatmul.mubr.bf16.gmra.mrb[8].mxu0 %v1756_v44  ;;  %729 = vmatmul.mubr.bf16.gmra.mrb[8].mxu1 %v1756_v44 }
  0x4b   : > { %758 = vmatpush1.bf16.msra.mxu0 %v1757_v45  ;;  %1612 = vmatpush1.bf16.msra.mxu1 %v1757_v45 }
  0x4c   : > { %759 = vmatprep.subr.bf16.mxu0 %v1762_v46  ;;  %1605 = vmatprep.subr.bf16.mxu1 %v1762_v46 }
  0x4d   : > { %665 = vmatprep.mubr.bf16.mxu0 %v1882_v2  ;;  %738 = vmatprep.mubr.bf16.mxu1 %v1882_v2 }
  0x4f   : > { %760 = vmatpush1.bf16.msra.mxu0 %v1760_v47  ;;  %1613 = vmatpush1.bf16.msra.mxu1 %v1760_v47 }
  0x50   : > { %761 = vmatprep.subr.bf16.mxu0 %v1766_v48  ;;  %1606 = vmatprep.subr.bf16.mxu1 %v1766_v48 }
  0x52   : > { %666 = vmatmul.mubr.bf16.gmra.mrb[12].mxu0 %v1763_v49  ;;  %739 = vmatmul.mubr.bf16.gmra.mrb[12].mxu1 %v1763_v49 }
  0x53   : > { %762 = vmatpush1.bf16.msra.mxu0 %v1764_v50  ;;  %1614 = vmatpush1.bf16.msra.mxu1 %v1764_v50 }
  0x54   : > { %763 = vmatprep.subr.bf16.mxu0 %v1769_v51  ;;  %1607 = vmatprep.subr.bf16.mxu1 %v1769_v51 }
  0x55   : > { %781 = vmatprep.mubr.bf16.mxu0 %v1882_v2  ;;  %801 = vmatprep.mubr.bf16.mxu1 %v1882_v2 }
  0x57   : > { %764 = vmatpush1.bf16.msra.mxu0 %v1767_v52  ;;  %1615 = vmatpush1.bf16.msra.mxu1 %v1767_v52 }
  0x5a   : > { %782 = vmatmul.mubr.bf16.vlgmr.msra.gmra.mrb[16].mxu0 %v2095_v34  ;;  %802 = vmatmul.mubr.bf16.vlgmr.msra.gmra.mrb[16].mxu1 %v1756_v44  ;;  %v2235_v34 = vld [vmem:[%s3082_s3 + $0x28] sm:$0xff] }
  0x5b   : > { %791 = vmatprep.mubr.bf16.mxu0 %v1882_v2  ;;  %811 = vmatprep.mubr.bf16.mxu1 %v1882_v2  ;;  %v2251_v42 = vrot.slane %v2235_v34, %v317_v63 }
  0x62   : > { %792 = vmatmul.mubr.bf16.gmra.mrb[20].mxu0 %v1749_v39  ;;  %812 = vmatmul.mubr.bf16.gmra.mrb[20].mxu1 %v1763_v49  ;;  %v2245_v39 = vrot.slane %v2220_v27, %v317_v63 }
 0x10d   : > { %v637_v54 = vpop.f32.mrb[0].mxu0  ;;  %v710_v55 = vpop.f32.mrb[0].mxu1 }
 0x10e   : > { %v639_v57 = vpop.f32.mrb[1].mxu0  ;;  %v712_v58 = vpop.f32.mrb[1].mxu1  ;;  %v2190_v14 = vadd.f32 %v637_v54, %v2172_v4  ;;  %v2223_v28 = vadd.f32 %v710_v55, %v2196_v16 }
 0x10f   : > { %v641_v59 = vpop.f32.mrb[2].mxu0  ;;  %v714_v60 = vpop.f32.mrb[2].mxu1  ;;  %v2193_v15 = vadd.f32 %v639_v57, %v2175_v5  ;;  %v2226_v29 = vadd.f32 %v712_v58, %v2199_v17 }
 0x110   : > { %v643_v61 = vpop.f32.mrb[3].mxu0  ;;  %v716_v62 = vpop.f32.mrb[3].mxu1  ;;  %v2202_v18 = vadd.f32 %v641_v59, %v2172_v4  ;;  %v878_v22 = vmul.f32 %v2190_v14, %v2190_v14  ;;  %3149 = vst [vmem:[#allocation8_spill] sm:$0xff] %v2223_v28  ;;  %v2238_v35 = vadd.f32 %v714_v60, %v2196_v16  ;;  %v880_v44 = vmul.f32 %v2223_v28, %v2223_v28 }
 0x111   : > { %3146 = vst [vmem:[#allocation5_spill] sm:$0xff] %v2193_v15  ;;  %v2205_v19 = vadd.f32 %v643_v61, %v2175_v5  ;;  %v822_v23 = vadd.f32 %v2193_v15, %v2190_v14  ;;  %v879_v24 = vmul.f32 %v2193_v15, %v2193_v15  ;;  %3150 = vst [vmem:[#allocation9_spill] sm:$0xff] %v2226_v29 }
 0x112   : > { %3147 = vst [vmem:[#allocation6_spill] sm:$0xff] %v2202_v18  ;;  %v884_v30 = vmul.f32 %v2202_v18, %v2202_v18  ;;  %3151 = vst [vmem:[#allocation10_spill] sm:$0xff] %v2238_v35  ;;  %v2248_v41 = vadd.f32 %v716_v62, %v2199_v17  ;;  %v881_v45 = vmul.f32 %v2226_v29, %v2226_v29 }
 0x113   : > { %3148 = vst [vmem:[#allocation7_spill] sm:$0xff] %v2205_v19  ;;  %v885_v31 = vmul.f32 %v2205_v19, %v2205_v19  ;;  %v829_v38 = vadd.f32 %v2205_v19, %v2202_v18  ;;  %v926_v40 = vadd.f32 %v879_v24, %v878_v22  ;;  %v823_v43 = vadd.f32 %v822_v23, %v2223_v28 }
 0x114   : > { %3152 = vst [vmem:[#allocation11_spill] sm:$0xff] %v2248_v41  ;;  %v886_v48 = vmul.f32 %v2238_v35, %v2238_v35  ;;  %v887_v59 = vmul.f32 %v2248_v41, %v2248_v41 }
 0x115   : > { %v647_v2 = vpop.f32.mrb[4].mxu0  ;;  %v720_v3 = vpop.f32.mrb[4].mxu1  ;;  %v933_v46 = vadd.f32 %v885_v31, %v884_v30  ;;  %v830_v52 = vadd.f32 %v829_v38, %v2238_v35  ;;  %v824_v63 = vadd.f32 %v823_v43, %v2226_v29 }
 0x116   : > { %v649_v6 = vpop.f32.mrb[5].mxu0  ;;  %v722_v7 = vpop.f32.mrb[5].mxu1  ;;  %v2259_v47 = vadd.f32 %v647_v2, %v2172_v4  ;;  %v2274_v53 = vadd.f32 %v720_v3, %v2196_v16  ;;  %v927_v2 = vadd.f32 %v926_v40, %v880_v44 }
 0x117   : > { %v651_v8 = vpop.f32.mrb[6].mxu0  ;;  %v724_v9 = vpop.f32.mrb[6].mxu1  ;;  %v2264_v49 = vadd.f32 %v649_v6, %v2175_v5  ;;  %v2289_v60 = vadd.f32 %v722_v7, %v2199_v17  ;;  %v934_v23 = vadd.f32 %v933_v46, %v886_v48 }
 0x118   : > { %v653_v12 = vpop.f32.mrb[7].mxu0  ;;  %v2187_v13 = vpop.f32.mrb[7].mxu1  ;;  %3153 = vst [vmem:[#allocation12_spill] sm:$0xff] %v2259_v47  ;;  %3157 = vst [vmem:[#allocation16_spill] sm:$0xff] %v2274_v53  ;;  %v890_v3 = vmul.f32 %v2259_v47, %v2259_v47  ;;  %v2299_v6 = vadd.f32 %v651_v8, %v2172_v4 }
 0x119   : > { %3154 = vst [vmem:[#allocation13_spill] sm:$0xff] %v2264_v49  ;;  %3160 = vst [vmem:[#allocation19_spill] sm:$0xff] %v2289_v60  ;;  %v836_v24 = vadd.f32 %v2264_v49, %v2259_v47  ;;  %v2313_v30 = vadd.f32 %v653_v12, %v2175_v5  ;;  %v2330_v38 = vadd.f32 %v2187_v13, %v2199_v17 }
 0x11a   : > { %3161 = vst [vmem:[#allocation20_spill] sm:$0xff] %v2299_v6  ;;  %v2336_v40 = vmul.f32 %v2289_v60, %v2289_v60  ;;  %v896_v13 = vmul.f32 %v2299_v6, %v2299_v6 }
 0x11b   : > { %3163 = vst [vmem:[#allocation22_spill] sm:$0xff] %v2313_v30  ;;  %3164 = vst [vmem:[#allocation23_spill] sm:$0xff] %v2330_v38  ;;  %v897_v19 = vmul.f32 %v2313_v30, %v2313_v30  ;;  %v2365_v18 = vmul.f32 %v2330_v38, %v2330_v38 }
 0x11d   : > { %v657_v20 = vpop.f32.mrb[8].mxu0  ;;  %v2207_v21 = vpop.f32.mrb[8].mxu1 }
 0x11e   : > { %v659_v25 = vpop.f32.mrb[9].mxu0  ;;  %v2215_v26 = vpop.f32.mrb[9].mxu1  ;;  %v2277_v54 = vadd.f32 %v657_v20, %v2172_v4  ;;  %v2302_v20 = vadd.f32 %v724_v9, %v2196_v16 }
 0x11f   : > { %v661_v32 = vpop.f32.mrb[10].mxu0  ;;  %v734_v33 = vpop.f32.mrb[10].mxu1  ;;  %v2280_v55 = vadd.f32 %v659_v25, %v2175_v5  ;;  %v891_v25 = vmul.f32 %v2264_v49, %v2264_v49  ;;  %v935_v49 = vadd.f32 %v934_v23, %v887_v59  ;;  %v2372_v23 = vadd.f32 %v2215_v26, %v2199_v17 }
 0x120   : > { %v663_v36 = vpop.f32.mrb[11].mxu0  ;;  %v2240_v37 = vpop.f32.mrb[11].mxu1  ;;  %v2267_v50 = vadd.f32 %v661_v32, %v2172_v4  ;;  %3158 = vst [vmem:[#allocation17_spill] sm:$0xff] %v2277_v54  ;;  %3162 = vst [vmem:[#allocation21_spill] sm:$0xff] %v2302_v20  ;;  %v2322_v32 = vadd.f32 %v830_v52, %v2248_v41  ;;  %v2341_v44 = vadd.f32 %v734_v33, %v2196_v16 }
 0x121   : > { %v2270_v51 = vadd.f32 %v663_v36, %v2175_v5  ;;  %3159 = vst [vmem:[#allocation18_spill] sm:$0xff] %v2280_v55  ;;  %v2326_v36 = vmul.f32 %v2274_v53, %v2274_v53  ;;  %v850_v12 = vadd.f32 %v2280_v55, %v2277_v54  ;;  %v2349_v48 = vmul.f32 %v2302_v20, %v2302_v20 }
 0x122   : > { %3155 = vst [vmem:[#allocation14_spill] sm:$0xff] %v2267_v50  ;;  %v908_v43 = vmul.f32 %v2267_v50, %v2267_v50  ;;  %3165 = vst [vmem:[#allocation24_spill] sm:$0xff] %v2341_v44  ;;  %v2353_v52 = vadd.f32 %v2207_v21, %v2196_v16  ;;  %v2355_v47 = vadd.f32 %v891_v25, %v890_v3 }
 0x123   : > { %3156 = vst [vmem:[#allocation15_spill] sm:$0xff] %v2270_v51  ;;  %v857_v8 = vadd.f32 %v2270_v51, %v2267_v50  ;;  %v909_v46 = vmul.f32 %v2270_v51, %v2270_v51  ;;  %v837_v33 = vadd.f32 %v836_v24, %v2274_v53  ;;  %v843_v41 = vadd.f32 %v2313_v30, %v2299_v6 }
 0x124   : > { %v851_v21 = vadd.f32 %v850_v12, %v2353_v52  ;;  %v2368_v3 = vadd.f32 %v927_v2, %v881_v45  ;;  %v2376_v25 = vadd.f32 %v2240_v37, %v2199_v17  ;;  %v902_v12 = vmul.f32 %v2277_v54, %v2277_v54 }
 0x125   : > { %v2282_v57 = vpop.f32.mrb[12].mxu0  ;;  %v2284_v58 = vpop.f32.mrb[12].mxu1  ;;  %v858_v35 = vadd.f32 %v857_v8, %v2341_v44  ;;  %v961_v24 = vadd.f32 %v909_v46, %v908_v43  ;;  %v903_v45 = vmul.f32 %v2280_v55, %v2280_v55 }
 0x126   : > { %v2291_v61 = vpop.f32.mrb[13].mxu0  ;;  %v2293_v62 = vpop.f32.mrb[13].mxu1  ;;  %3166 = vst [vmem:[#allocation25_spill] sm:$0xff] %v2376_v25 }
 0x127   : > { %v2304_v22 = vpop.f32.mrb[14].mxu0  ;;  %v2306_v7 = vpop.f32.mrb[14].mxu1  ;;  %v859_v55 = vadd.f32 %v858_v35, %v2376_v25  ;;  %v911_v35 = vmul.f32 %v2376_v25, %v2376_v25  ;;  %v947_v25 = vadd.f32 %v897_v19, %v896_v13 }
 0x128   : > { %v2317_v31 = vpop.f32.mrb[15].mxu0  ;;  %v2319_v9 = vpop.f32.mrb[15].mxu1 }
 0x12d   : > { %v783_v51 = vpop.f32.mrb[16].mxu0  ;;  %v803_v59 = vpop.f32.mrb[16].mxu1 }
 0x12e   : > { %v2379_v8 = vadd.f32 %v783_v51, %v2245_v39  ;;  %v785_v30 = vpop.f32.mrb[17].mxu0  ;;  %v805_v6 = vpop.f32.mrb[17].mxu1  ;;  %v2386_v2 = vadd.f32 %v803_v59, %v2245_v39  ;;  %v910_v51 = vmul.f32 %v2341_v44, %v2341_v44  ;;  %v852_v59 = vadd.f32 %v851_v21, %v2372_v23 }
 0x12f   : > { %v2389_v26 = vadd.f32 %v785_v30, %v2251_v42  ;;  %v787_v43 = vpop.f32.mrb[18].mxu0  ;;  %v807_v37 = vpop.f32.mrb[18].mxu1  ;;  %v2415_v21 = vadd.f32 %v805_v6, %v2251_v42  ;;  %v2427_v6 = vadd.f32 %v2282_v57, %v2172_v4 }
 0x130   : > { %v2394_v46 = vadd.f32 %v787_v43, %v2245_v39  ;;  %v2397_v53 = vadd.f32 %v807_v37, %v2245_v39  ;;  %v789_v54 = vpop.f32.mrb[19].mxu0  ;;  %v809_v50 = vpop.f32.mrb[19].mxu1  ;;  %v825_v44 = vadd.f32 %v824_v63, %v2379_v8  ;;  %v838_v43 = vadd.f32 %v837_v33, %v2289_v60 }
 0x131   : > { %v2402_v30 = vadd.f32 %v789_v54, %v2251_v42  ;;  %v2405_v29 = vadd.f32 %v809_v50, %v2251_v42  ;;  %v962_v15 = vadd.f32 %v961_v24, %v910_v51  ;;  %v853_v50 = vadd.f32 %v852_v59, %v2386_v2  ;;  %3168 = vst [vmem:[#allocation27_spill] sm:$0xff] %v2427_v6 }
 0x132   : > { %3167 = vst [vmem:[#allocation26_spill] sm:$0xff] %v2397_v53  ;;  %v888_v37 = vmul.f32 %v2394_v46, %v2394_v46  ;;  %v860_v28 = vadd.f32 %v859_v55, %v2397_v53  ;;  %v826_v54 = vadd.f32 %v825_v44, %v2389_v26  ;;  %v912_v63 = vmul.f32 %v2397_v53, %v2397_v53 }
 0x133   : > { %v889_v60 = vmul.f32 %v2402_v30, %v2402_v30  ;;  %v844_v24 = vadd.f32 %v843_v41, %v2302_v20  ;;  %v954_v51 = vadd.f32 %v903_v45, %v902_v12  ;;  %v2431_v44 = vadd.f32 %v2291_v61, %v2175_v5 }
 0x134   : > { %v861_v33 = vadd.f32 %v860_v28, %v2405_v29  ;;  %v936_v55 = vadd.f32 %v935_v49, %v888_v37  ;;  %827 = vadd.xlane.f32.xlu0 %v826_v54  ;;  %v2435_v28 = vadd.f32 %v2304_v22, %v2172_v4  ;;  %v2439_v41 = vadd.f32 %v2317_v31, %v2175_v5 }
 0x135   : > { %3169 = vst [vmem:[#allocation28_spill] sm:$0xff] %v2431_v44  ;;  %v793_v59 = vpop.f32.mrb[20].mxu0  ;;  %v813_v53 = vpop.f32.mrb[20].mxu1  ;;  %v963_v57 = vadd.f32 %v962_v15, %v911_v35  ;;  %v904_v61 = vmul.f32 %v2353_v52, %v2353_v52  ;;  %v882_v45 = vmul.f32 %v2379_v8, %v2379_v8  ;;  %v854_v13 = vadd.f32 %v853_v50, %v2415_v21 }
 0x136   : > { %3170 = vst [vmem:[#allocation29_spill] sm:$0xff] %v2435_v28  ;;  %3171 = vst [vmem:[#allocation30_spill] sm:$0xff] %v2439_v41  ;;  %v795_v49 = vpop.f32.mrb[21].mxu0  ;;  %v815_v12 = vpop.f32.mrb[21].mxu1  ;;  %862 = vadd.xlane.f32.xlu1 %v861_v33  ;;  %v832_v4 = vadd.f32 %v2322_v32, %v2394_v46  ;;  %v2449_v5 = vadd.f32 %v793_v59, %v2245_v39  ;;  %v937_v54 = vadd.f32 %v936_v55, %v889_v60 }
 0x137   : > { %v797_v37 = vpop.f32.mrb[22].mxu0  ;;  %v817_v19 = vpop.f32.mrb[22].mxu1  ;;  %v913_v15 = vmul.f32 %v2405_v29, %v2405_v29  ;;  %v964_v35 = vadd.f32 %v963_v57, %v912_v63  ;;  %v845_v33 = vadd.f32 %v844_v24, %v2330_v38  ;;  %v905_v20 = vmul.f32 %v2372_v23, %v2372_v23 }
 0x138   : > { %3172 = vst [vmem:[#allocation31_spill] sm:$0xff] %v2449_v5  ;;  %v799_v22 = vpop.f32.mrb[23].mxu0  ;;  %v819_v31 = vpop.f32.mrb[23].mxu1  ;;  %v864_v50 = vadd.f32 %v2431_v44, %v2427_v6  ;;  %855 = vadd.xlane.f32.xlu0 %v854_v13  ;;  %v955_v32 = vadd.f32 %v954_v51, %v904_v61  ;;  %v2460_v59 = vadd.f32 %v2284_v58, %v2196_v16 }
 0x139   : > { %v2464_v60 = vadd.f32 %v2293_v62, %v2199_v17  ;;  %v2468_v63 = vadd.f32 %v2306_v7, %v2196_v16  ;;  %v871_v55 = vadd.f32 %v2439_v41, %v2435_v28  ;;  %v906_v24 = vmul.f32 %v2386_v2, %v2386_v2 }
 0x13a   : > { %3173 = vst [vmem:[#allocation32_spill] sm:$0xff] %v2460_v59  ;;  %938 = vadd.xlane.f32.xlu1 %v937_v54  ;;  %v833_v51 = vadd.f32 %v832_v4, %v2402_v30  ;;  %v883_v58 = vmul.f32 %v2389_v26, %v2389_v26  ;;  %v929_v57 = vadd.f32 %v2368_v3, %v882_v45 }
 0x13b   : > { %3174 = vst [vmem:[#allocation33_spill] sm:$0xff] %v2464_v60  ;;  %3175 = vst [vmem:[#allocation34_spill] sm:$0xff] %v2468_v63  ;;  %v2479_v62 = vadd.f32 %v795_v49, %v2251_v42  ;;  %v2482_v16 = vadd.f32 %v797_v37, %v2245_v39  ;;  %v965_v7 = vadd.f32 %v964_v35, %v913_v15 }
 0x13c   : > { %v839_v61 = vadd.f32 %v838_v43, %v2449_v5  ;;  %v914_v13 = vmul.f32 %v2427_v6, %v2427_v6  ;;  %v915_v4 = vmul.f32 %v2431_v44, %v2431_v44  ;;  %v865_v54 = vadd.f32 %v864_v50, %v2460_v59  ;;  %834 = vadd.xlane.f32.xlu0 %v833_v51 }
 0x13d   : > { %3176 = vst [vmem:[#allocation35_spill] sm:$0xff] %v2479_v62  ;;  %3177 = vst [vmem:[#allocation36_spill] sm:$0xff] %v2482_v16  ;;  %v956_v38 = vadd.f32 %v955_v32, %v905_v20  ;;  %v920_v3 = vmul.f32 %v2435_v28, %v2435_v28  ;;  %v921_v49 = vmul.f32 %v2439_v41, %v2439_v41 }
 0x13e   : > { %v2496_v45 = vadd.f32 %v2319_v9, %v2199_v17  ;;  %v872_v43 = vadd.f32 %v871_v55, %v2468_v63  ;;  %966 = vadd.xlane.f32.xlu1 %v965_v7  ;;  %v2500_v37 = vadd.f32 %v813_v53, %v2245_v39  ;;  %v930_v15 = vadd.f32 %v929_v57, %v883_v58 }
 0x13f   : > { %v907_v20 = vmul.f32 %v2415_v21, %v2415_v21  ;;  %v957_v35 = vadd.f32 %v956_v38, %v906_v24  ;;  %v2505_v50 = vadd.f32 %v817_v19, %v2245_v39  ;;  %v2508_v32 = vadd.f32 %v799_v22, %v2251_v42 }
 0x140   : > { %3178 = vst [vmem:[#allocation37_spill] sm:$0xff] %v2496_v45  ;;  %3179 = vst [vmem:[#allocation38_spill] sm:$0xff] %v2500_v37  ;;  %v840_v17 = vadd.f32 %v839_v61, %v2479_v62  ;;  %v846_v9 = vadd.f32 %v845_v33, %v2482_v16  ;;  %v968_v55 = vadd.f32 %v915_v4, %v914_v13  ;;  %931 = vadd.xlane.f32.xlu0 %v930_v15 }
 0x141   : > { %3180 = vst [vmem:[#allocation39_spill] sm:$0xff] %v2505_v50  ;;  %3181 = vst [vmem:[#allocation40_spill] sm:$0xff] %v2508_v32  ;;  %v866_v51 = vadd.f32 %v865_v54, %v2464_v60  ;;  %v941_v53 = vadd.f32 %v2355_v47, %v2326_v36  ;;  %v948_v58 = vadd.f32 %v947_v25, %v2349_v48 }
 0x142   : > { %v916_v39 = vmul.f32 %v2460_v59, %v2460_v59  ;;  %v922_v38 = vmul.f32 %v2468_v63, %v2468_v63  ;;  %v975_v19 = vadd.f32 %v921_v49, %v920_v3  ;;  %v873_v22 = vadd.f32 %v872_v43, %v2496_v45  ;;  %841 = vadd.xlane.f32.xlu1 %v840_v17 }
 0x143   : > { %v894_v33 = vmul.f32 %v2449_v5, %v2449_v5  ;;  %v2524_v24 = vadd.f32 %v815_v12, %v2251_v42  ;;  %v958_v57 = vadd.f32 %v957_v35, %v907_v20  ;;  %v867_v47 = vadd.f32 %v866_v51, %v2500_v37 }
 0x144   : > { %v900_v36 = vmul.f32 %v2482_v16, %v2482_v16  ;;  %v2530_v48 = vadd.f32 %v819_v31, %v2251_v42  ;;  %v847_v25 = vadd.f32 %v846_v9, %v2508_v32  ;;  %v874_v7 = vadd.f32 %v873_v22, %v2505_v50 }
 0x145   : > { %3182 = vst [vmem:[#allocation41_spill] sm:$0xff] %v2524_v24  ;;  %959 = vadd.xlane.f32.xlu0 %v958_v57  ;;  %v942_v61 = vadd.f32 %v941_v53, %v2336_v40  ;;  %v969_v13 = vadd.f32 %v968_v55, %v916_v39  ;;  %v917_v12 = vmul.f32 %v2464_v60, %v2464_v60 }
 0x146   : > { %3183 = vst [vmem:[#allocation42_spill] sm:$0xff] %v2530_v48  ;;  %v923_v4 = vmul.f32 %v2496_v45, %v2496_v45  ;;  %848 = vadd.xlane.f32.xlu1 %v847_v25  ;;  %v949_v54 = vadd.f32 %v948_v58, %v2365_v18  ;;  %v976_v3 = vadd.f32 %v975_v19, %v922_v38 }
 0x147   : > { %v918_v42 = vmul.f32 %v2500_v37, %v2500_v37  ;;  %v868_v31 = vadd.f32 %v867_v47, %v2524_v24  ;;  %v895_v49 = vmul.f32 %v2479_v62, %v2479_v62  ;;  %v943_v40 = vadd.f32 %v942_v61, %v894_v33 }
 0x148   : > { %v924_v43 = vmul.f32 %v2505_v50, %v2505_v50  ;;  %v875_v15 = vadd.f32 %v874_v7, %v2530_v48  ;;  %v901_v20 = vmul.f32 %v2508_v32, %v2508_v32  ;;  %v950_v35 = vadd.f32 %v949_v54, %v900_v36  ;;  %v3197_v50 = vld [vmem:[#allocation7_spill] sm:$0xff] }
 0x149   : > { %869 = vadd.xlane.f32.xlu0 %v868_v31  ;;  %v970_v18 = vadd.f32 %v969_v13, %v917_v12  ;;  %v977_v17 = vadd.f32 %v976_v3, %v923_v4  ;;  %v944_v9 = vadd.f32 %v943_v40, %v895_v49  ;;  %v919_v55 = vmul.f32 %v2524_v24, %v2524_v24 }
 0x14a   : > { %876 = vadd.xlane.f32.xlu1 %v875_v15  ;;  %v951_v53 = vadd.f32 %v950_v35, %v901_v20  ;;  %v925_v58 = vmul.f32 %v2530_v48, %v2530_v48  ;;  %v1136_v7 = vsub.s32 1, %v2158_v56  ;;  %v1208_v4 = vsub.s32 2, %v2158_v56 }
 0x14b   : > { %v971_v51 = vadd.f32 %v970_v18, %v918_v42  ;;  %v978_v39 = vadd.f32 %v977_v17, %v924_v43 }
 0x14c   : > { %v2567_v43 = vrot.slane %v2164_v0, %v1136_v7  ;;  %v2572_v56 = vrot.slane %v2164_v0, %v1208_v4  ;;  %v2575_v17 = vrot.slane %v2180_v10, %v1136_v7  ;;  %v2589_v0 = vrot.slane %v2185_v11, %v1136_v7 }
 0x14d   : > { %945 = vadd.xlane.f32.xlu0 %v944_v9  ;;  %v972_v38 = vadd.f32 %v971_v51, %v919_v55  ;;  %v979_v19 = vadd.f32 %v978_v39, %v925_v58  ;;  %v2580_v51 = vrot.slane %v2180_v10, %v1208_v4  ;;  %v2598_v10 = vrot.slane %v2220_v27, %v1208_v4 }
 0x14e   : > { %952 = vadd.xlane.f32.xlu1 %v951_v53  ;;  %v2583_v53 = vrot.slane %v2169_v1, %v1136_v7 }
 0x151   : > { %973 = vadd.xlane.f32.xlu0 %v972_v38  ;;  %v2586_v38 = vrot.slane %v2169_v1, %v1208_v4 }
 0x152   : > { %980 = vadd.xlane.f32.xlu1 %v979_v19  ;;  %v2592_v19 = vrot.slane %v2185_v11, %v1208_v4 }
 0x1c1   : > { %v828_v22 = vpop.xlane.xlu0 %827 }
 0x1c2   : > { %v2557_v61 = vmul.f32 0.0013020834, %v828_v22 }
 0x1c3   : > { %v863_v33 = vpop.xlane.xlu1 %862 }
 0x1c4   : > { %v2554_v36 = vmul.f32 0.0013020834, %v863_v33  ;;  %v998_v20 = vmul.f32 %v2557_v61, %v2557_v61 }
 0x1c5   : > { %v856_v57 = vpop.xlane.xlu0 %855 }
 0x1c6   : > { %v1003_v54 = vmul.f32 %v2554_v36, %v2554_v36  ;;  %v2577_v9 = vmul.f32 0.0013020834, %v856_v57  ;;  %v2595_v57 = vrot.slane %v2220_v27, %v1136_v7  ;;  %v3184_v27 = vld [vmem:[#allocation5_spill] sm:$0xff] }
 0x1c7   : > { %v939_v47 = vpop.xlane.xlu1 %938 }
 0x1c8   : > { %v991_v42 = vmul.f32 0.0013020834, %v939_v47  ;;  %v2601_v47 = vrot.slane %v2235_v34, %v1136_v7  ;;  %v3185_v7 = vld [vmem:[#allocation8_spill] sm:$0xff] }
 0x1c9   : > { %v835_v25 = vpop.xlane.xlu0 %834 }
 0x1ca   : > { %v2559_v13 = vmul.f32 0.0013020834, %v835_v25 }
 0x1cb   : > { %v967_v12 = vpop.xlane.xlu1 %966 }
 0x1cc   : > { %v995_v3 = vmul.f32 0.0013020834, %v967_v12  ;;  %v999_v31 = vmul.f32 %v2559_v13, %v2559_v13 }
 0x1cd   : > { %v932_v40 = vpop.xlane.xlu0 %931 }
 0x1ce   : > { %v1011_v49 = vsub.f32 %v995_v3, %v1003_v54  ;;  %v1007_v15 = vsub.f32 %v991_v42, %v999_v31  ;;  %v990_v35 = vmul.f32 0.0013020834, %v932_v40  ;;  %v1002_v54 = vmul.f32 %v2577_v9, %v2577_v9  ;;  %v3186_v40 = vld [vmem:[#allocation9_spill] sm:$0xff] }
 0x1cf   : > { %v842_v18 = vpop.xlane.xlu1 %841  ;;  %v2606_v3 = vrot.slane %v2235_v34, %v1208_v4  ;;  %v3187_v4 = vld [vmem:[#allocation14_spill] sm:$0xff]  ;;  %v1073_v34 = vsub.f32 %v2405_v29, %v2554_v36  ;;  %v1048_v29 = vsub.f32 %v2394_v46, %v2559_v13 }
 0x1d0   : > { %v1019_v55 = vmax.f32 %v1011_v49, 0.0  ;;  %v1015_v58 = vmax.f32 %v1007_v15, 0.0  ;;  %v1006_v39 = vsub.f32 %v990_v35, %v998_v20  ;;  %v3190_v15 = vld [vmem:[#allocation25_spill] sm:$0xff]  ;;  %v2636_v45 = vmul.f32 0.0013020834, %v842_v18  ;;  %v3196_v18 = vld [vmem:[#allocation6_spill] sm:$0xff] }
 0x1d1   : > { %v1071_v31 = vsub.f32 %v3190_v15, %v2554_v36  ;;  %v3199_v15 = vld [vmem:[#allocation11_spill] sm:$0xff] }
 0x1d2   : > { %v1027_v22 = vadd.f32 1e-05, %v1019_v55  ;;  %v960_v33 = vpop.xlane.xlu0 %959  ;;  %v1023_v25 = vadd.f32 1e-05, %v1015_v58  ;;  %v1014_v12 = vmax.f32 %v1006_v39, 0.0  ;;  %v1068_v58 = vsub.f32 %v3187_v4, %v2554_v36  ;;  %v3188_v39 = vld [vmem:[#allocation15_spill] sm:$0xff] }
 0x1d3   : > { %v849_v1 = vpop.xlane.xlu1 %848  ;;  %v994_v11 = vmul.f32 0.0013020834, %v960_v33  ;;  %v3189_v33 = vld [vmem:[#allocation24_spill] sm:$0xff]  ;;  %v3192_v4 = vld [vmem:[#allocation17_spill] sm:$0xff]  ;;  %3194 = vst [vmem:[#allocation5_spill] sm:$0xff] %v2636_v45  ;;  %v1047_v41 = vsub.f32 %v3199_v15, %v2559_v13 }
 0x1d4   : > { %1770 = vrsqrt.f32 %v1027_v22  ;;  %v1069_v22 = vsub.f32 %v3188_v39, %v2554_v36  ;;  %v1022_v20 = vadd.f32 1e-05, %v1014_v12  ;;  %v3193_v39 = vld [vmem:[#allocation18_spill] sm:$0xff]  ;;  %v2642_v12 = vmul.f32 0.0013020834, %v849_v1 }
 0x1d5   : > { %1772 = vrsqrt.f32 %v1023_v25  ;;  %v1010_v35 = vsub.f32 %v994_v11, %v1002_v54  ;;  %v1070_v25 = vsub.f32 %v3189_v33, %v2554_v36  ;;  %v3191_v54 = vld [vmem:[#allocation26_spill] sm:$0xff]  ;;  %v1045_v33 = vsub.f32 %v3197_v50, %v2559_v13 }
 0x1d6   : > { %v870_v55 = vpop.xlane.xlu0 %869  ;;  %v1072_v11 = vsub.f32 %v3191_v54, %v2554_v36  ;;  %3195 = vst [vmem:[#allocation8_spill] sm:$0xff] %v2642_v12  ;;  %1774 = vrsqrt.f32 %v1022_v20  ;;  %v1049_v36 = vsub.f32 %v2402_v30, %v2559_v13  ;;  %v2667_v50 = vmul.f32 %v2636_v45, %v2636_v45  ;;  %v1310_v45 = vld [vmem:[%s2681_s13 + $0x100] sm:$0xff] }
 0x1d7   : > { %v877_v49 = vpop.xlane.xlu1 %876  ;;  %v1018_v42 = vmax.f32 %v1010_v35, 0.0  ;;  %v1044_v35 = vsub.f32 %v3196_v18, %v2559_v13  ;;  %v2661_v28 = vmul.f32 0.0013020834, %v870_v55  ;;  %v2674_v46 = vmul.f32 %v2642_v12, %v2642_v12 }
 0x1d8   : > { %v2663_v18 = vmul.f32 0.0013020834, %v877_v49 }
 0x1d9   : > { %v1026_v54 = vadd.f32 1e-05, %v1018_v42  ;;  %v3198_v42 = vld [vmem:[#allocation10_spill] sm:$0xff] }
 0x1da   : > { %v946_v48 = vpop.xlane.xlu0 %945  ;;  %v1046_v1 = vsub.f32 %v3198_v42, %v2559_v13  ;;  %3200 = vst [vmem:[#allocation9_spill] sm:$0xff] %v2663_v18 }
 0x1db   : > { %v953_v63 = vpop.xlane.xlu1 %952  ;;  %1776 = vrsqrt.f32 %v1026_v54  ;;  %v2670_v15 = vmul.f32 0.0013020834, %v946_v48 }
 0x1dc   : > { %v2676_v20 = vmul.f32 0.0013020834, %v953_v63 }
 0x1de   : > { %v1771_v24 = vpop.eup %1770 }
 0x1df   : > { %v1773_v30 = vpop.eup %1772  ;;  %v1116_v13 = vmul.f32 %v1771_v24, %v1068_v58  ;;  %v1117_v49 = vmul.f32 %v1771_v24, %v1069_v22  ;;  %v1118_v55 = vmul.f32 %v1771_v24, %v1070_v25  ;;  %v1119_v54 = vmul.f32 %v1771_v24, %v1071_v31  ;;  %v1284_v58 = vld [vmem:[%s2681_s13 + $0x30] sm:$0xff] }
 0x1e0   : > { %v1092_v48 = vmul.f32 %v1773_v30, %v1044_v35  ;;  %v1093_v42 = vmul.f32 %v1773_v30, %v1045_v33  ;;  %v1094_v37 = vmul.f32 %v1773_v30, %v1046_v1  ;;  %v1095_v60 = vmul.f32 %v1773_v30, %v1047_v41  ;;  %v1285_v35 = vld [vmem:[%s2681_s13 + $0x38] sm:$0xff]  ;;  %v1286_v41 = vld [vmem:[%s2681_s13 + $0x40] sm:$0xff]  ;;  %v1287_v1 = vld [vmem:[%s2681_s13 + $0x48] sm:$0xff] }
 0x1e1   : > { %v1096_v63 = vmul.f32 %v1773_v30, %v1048_v29  ;;  %v1097_v59 = vmul.f32 %v1773_v30, %v1049_v36  ;;  %v1120_v44 = vmul.f32 %v1771_v24, %v1072_v11  ;;  %v1121_v6 = vmul.f32 %v1771_v24, %v1073_v34  ;;  %v1288_v34 = vld [vmem:[%s2681_s13 + $0x50] sm:$0xff]  ;;  %v1289_v11 = vld [vmem:[%s2681_s13 + $0x58] sm:$0xff] }
 0x1e2   : > { %v1164_v22 = vmul.f32 %v2567_v43, %v1092_v48  ;;  %v1165_v31 = vmul.f32 %v2583_v53, %v1093_v42  ;;  %v1166_v25 = vmul.f32 %v2575_v17, %v1094_v37  ;;  %v1167_v33 = vmul.f32 %v2589_v0, %v1095_v60 }
 0x1e3   : > { %v1168_v32 = vmul.f32 %v2595_v57, %v1096_v63  ;;  %v1169_v29 = vmul.f32 %v2601_v47, %v1097_v59  ;;  %v1188_v36 = vmul.f32 %v2567_v43, %v1116_v13  ;;  %v1189_v24 = vmul.f32 %v2583_v53, %v1117_v49  ;;  %v1775_v63 = vpop.eup %1774 }
 0x1e4   : > { %v1236_v30 = vadd.f32 %v2572_v56, %v1164_v22  ;;  %v1237_v37 = vadd.f32 %v2586_v38, %v1165_v31  ;;  %v1238_v60 = vadd.f32 %v2580_v51, %v1166_v25  ;;  %v1239_v48 = vadd.f32 %v2592_v19, %v1167_v33  ;;  %v1308_v25 = vld [vmem:[%s2681_s13 + $0xf0] sm:$0xff]  ;;  %v1309_v33 = vld [vmem:[%s2681_s13 + $0xf8] sm:$0xff] }
 0x1e5   : > { %v1240_v59 = vadd.f32 %v2598_v10, %v1168_v32  ;;  %v1241_v13 = vadd.f32 %v2606_v3, %v1169_v29  ;;  %v1190_v49 = vmul.f32 %v2575_v17, %v1118_v55  ;;  %v1191_v42 = vmul.f32 %v2589_v0, %v1119_v54  ;;  %v1311_v32 = vld [vmem:[%s2681_s13 + $0x108] sm:$0xff]  ;;  %v1777_v18 = vpop.eup %1776  ;;  %v1312_v54 = vld [vmem:[%s2681_s13 + $0x110] sm:$0xff] }
 0x1e6   : > { %v1332_v22 = vadd.f32 %v1284_v58, %v1236_v30  ;;  %v1333_v16 = vadd.f32 %v1285_v35, %v1237_v37  ;;  %v1334_v12 = vadd.f32 %v1286_v41, %v1238_v60  ;;  %v1335_v31 = vadd.f32 %v1287_v1, %v1239_v48  ;;  %v1313_v58 = vld [vmem:[%s2681_s13 + $0x118] sm:$0xff] }
 0x1e7   : > { %v1336_v62 = vadd.f32 %v1288_v34, %v1240_v59  ;;  %v1337_v5 = vadd.f32 %v1289_v11, %v1241_v13  ;;  %v1192_v29 = vmul.f32 %v2595_v57, %v1120_v44  ;;  %v1193_v55 = vmul.f32 %v2601_v47, %v1121_v6 }
 0x1e8   : > { %1380 = vst [vmem:[%s2716_s23 + $0x30] sm:$0xff] %v1332_v22  ;;  %1381 = vst [vmem:[%s2716_s23 + $0x38] sm:$0xff] %v1333_v16  ;;  %v1260_v35 = vadd.f32 %v2572_v56, %v1188_v36  ;;  %v1261_v44 = vadd.f32 %v2586_v38, %v1189_v24  ;;  %v1262_v6 = vadd.f32 %v2580_v51, %v1190_v49  ;;  %v1278_v22 = vld [vmem:[%s2681_s13] sm:$0xff] }
 0x1e9   : > { %1382 = vst [vmem:[%s2716_s23 + $0x40] sm:$0xff] %v1334_v12  ;;  %1383 = vst [vmem:[%s2716_s23 + $0x48] sm:$0xff] %v1335_v31  ;;  %v1263_v41 = vadd.f32 %v2592_v19, %v1191_v42  ;;  %v1264_v16 = vadd.f32 %v2598_v10, %v1192_v29  ;;  %v1265_v12 = vadd.f32 %v2606_v3, %v1193_v55  ;;  %v1279_v31 = vld [vmem:[%s2681_s13 + $0x8] sm:$0xff]  ;;  %v1281_v29 = vld [vmem:[%s2681_s13 + $0x18] sm:$0xff] }
 0x1ea   : > { %1384 = vst [vmem:[%s2716_s23 + $0x50] sm:$0xff] %v1336_v62  ;;  %1385 = vst [vmem:[%s2716_s23 + $0x58] sm:$0xff] %v1337_v5  ;;  %v3201_v1 = vsub.f32 %v2190_v14, %v2557_v61  ;;  %v3202_v24 = vsub.f32 %v3184_v27, %v2557_v61  ;;  %v1356_v11 = vadd.f32 %v1308_v25, %v1260_v35 }
 0x1eb   : > { %v1357_v30 = vadd.f32 %v1309_v33, %v1261_v44  ;;  %v1358_v62 = vadd.f32 %v1310_v45, %v1262_v6  ;;  %v1359_v5 = vadd.f32 %v1311_v32, %v1263_v41  ;;  %v1360_v37 = vadd.f32 %v1312_v54, %v1264_v16  ;;  %v1282_v44 = vld [vmem:[%s2681_s13 + $0x20] sm:$0xff]  ;;  %v1283_v6 = vld [vmem:[%s2681_s13 + $0x28] sm:$0xff] }
 0x1ec   : > { %v1086_v36 = vmul.f32 %v1775_v63, %v3201_v1  ;;  %v1087_v34 = vmul.f32 %v1775_v63, %v3202_v24  ;;  %v1361_v60 = vadd.f32 %v1313_v58, %v1265_v12  ;;  %v3203_v48 = vsub.f32 %v3185_v7, %v2557_v61  ;;  %1404 = vst [vmem:[%s2716_s23 + $0xf0] sm:$0xff] %v1356_v11 }
 0x1ed   : > { %v3204_v14 = vsub.f32 %v3186_v40, %v2557_v61  ;;  %1405 = vst [vmem:[%s2716_s23 + $0xf8] sm:$0xff] %v1357_v30  ;;  %1406 = vst [vmem:[%s2716_s23 + $0x100] sm:$0xff] %v1358_v62  ;;  %v3205_v45 = vsub.f32 %v2379_v8, %v2557_v61  ;;  %v3206_v49 = vsub.f32 %v2389_v26, %v2557_v61 }
 0x1ee   : > { %v1088_v59 = vmul.f32 %v1775_v63, %v3203_v48  ;;  %1407 = vst [vmem:[%s2716_s23 + $0x108] sm:$0xff] %v1359_v5  ;;  %v1158_v7 = vmul.f32 %v2567_v43, %v1086_v36  ;;  %v1159_v40 = vmul.f32 %v2583_v53, %v1087_v34  ;;  %1408 = vst [vmem:[%s2716_s23 + $0x110] sm:$0xff] %v1360_v37 }
 0x1ef   : > { %v1089_v13 = vmul.f32 %v1775_v63, %v3204_v14  ;;  %v1090_v27 = vmul.f32 %v1775_v63, %v3205_v45  ;;  %v1091_v42 = vmul.f32 %v1775_v63, %v3206_v49  ;;  %1409 = vst [vmem:[%s2716_s23 + $0x118] sm:$0xff] %v1361_v60  ;;  %v3207_v8 = vsub.f32 %v3192_v4, %v2577_v9  ;;  %v1280_v63 = vld [vmem:[%s2681_s13 + $0x10] sm:$0xff]  ;;  %v1305_v49 = vld [vmem:[%s2681_s13 + $0xd8] sm:$0xff] }
 0x1f0   : > { %v1160_v25 = vmul.f32 %v2575_v17, %v1088_v59  ;;  %v3208_v26 = vsub.f32 %v3193_v39, %v2577_v9  ;;  %v1230_v58 = vadd.f32 %v2572_v56, %v1158_v7  ;;  %v1231_v35 = vadd.f32 %v2586_v38, %v1159_v40  ;;  %v1304_v45 = vld [vmem:[%s2681_s13 + $0xd0] sm:$0xff]  ;;  %v1307_v7 = vld [vmem:[%s2681_s13 + $0xe8] sm:$0xff] }
 0x1f1   : > { %v1161_v33 = vmul.f32 %v2589_v0, %v1089_v13  ;;  %v1110_v32 = vmul.f32 %v1777_v18, %v3207_v8  ;;  %v1162_v55 = vmul.f32 %v2595_v57, %v1090_v27  ;;  %v1163_v54 = vmul.f32 %v2601_v47, %v1091_v42  ;;  %v1303_v13 = vld [vmem:[%s2681_s13 + $0xc8] sm:$0xff]  ;;  %v1306_v42 = vld [vmem:[%s2681_s13 + $0xe0] sm:$0xff] }
 0x1f2   : > { %v1111_v61 = vmul.f32 %v1777_v18, %v3208_v26  ;;  %v1232_v4 = vadd.f32 %v2580_v51, %v1160_v25  ;;  %v3209_v39 = vsub.f32 %v2353_v52, %v2577_v9  ;;  %v3210_v12 = vsub.f32 %v2372_v23, %v2577_v9 }
 0x1f3   : > { %v1233_v41 = vadd.f32 %v2592_v19, %v1161_v33  ;;  %v1234_v36 = vadd.f32 %v2598_v10, %v1162_v55  ;;  %v1235_v24 = vadd.f32 %v2606_v3, %v1163_v54  ;;  %v1326_v34 = vadd.f32 %v1278_v22, %v1230_v58  ;;  %v981_v55 = vpop.xlane.xlu1 %980 }
 0x1f4   : > { %v1112_v16 = vmul.f32 %v1777_v18, %v3209_v39  ;;  %v1113_v1 = vmul.f32 %v1777_v18, %v3210_v12  ;;  %v1327_v11 = vadd.f32 %v1279_v31, %v1231_v35  ;;  %v1328_v30 = vadd.f32 %v1280_v63, %v1232_v4 }
 0x1f5   : > { %v1329_v62 = vadd.f32 %v1281_v29, %v1233_v41  ;;  %v3211_v52 = vsub.f32 %v2386_v2, %v2577_v9  ;;  %v3212_v23 = vsub.f32 %v2415_v21, %v2577_v9  ;;  %v1330_v60 = vadd.f32 %v1282_v44, %v1234_v36  ;;  %1374 = vst [vmem:[%s2716_s23] sm:$0xff] %v1326_v34  ;;  %v1302_v2 = vld [vmem:[%s2681_s13 + $0xc0] sm:$0xff] }
 0x1f6   : > { %v1331_v48 = vadd.f32 %v1283_v6, %v1235_v24  ;;  %1375 = vst [vmem:[%s2716_s23 + $0x8] sm:$0xff] %v1327_v11  ;;  %v1182_v59 = vmul.f32 %v2567_v43, %v1110_v32  ;;  %v1183_v14 = vmul.f32 %v2583_v53, %v1111_v61  ;;  %1376 = vst [vmem:[%s2716_s23 + $0x10] sm:$0xff] %v1328_v30  ;;  %v974_v61 = vpop.xlane.xlu0 %973  ;;  %v3213_v41 = vld [vmem:[#allocation9_spill] sm:$0xff]  ;;  %v3215_v11 = vld [vmem:[#allocation12_spill] sm:$0xff] }
 0x1f7   : > { %v1114_v5 = vmul.f32 %v1777_v18, %v3211_v52  ;;  %v1115_v37 = vmul.f32 %v1777_v18, %v3212_v23  ;;  %1377 = vst [vmem:[%s2716_s23 + $0x18] sm:$0xff] %v1329_v62  ;;  %v1184_v21 = vmul.f32 %v2575_v17, %v1112_v16  ;;  %v1185_v9 = vmul.f32 %v2589_v0, %v1113_v1  ;;  %v3214_v34 = vld [vmem:[#allocation5_spill] sm:$0xff] }
 0x1f8   : > { %1378 = vst [vmem:[%s2716_s23 + $0x20] sm:$0xff] %v1330_v60  ;;  %1379 = vst [vmem:[%s2716_s23 + $0x28] sm:$0xff] %v1331_v48  ;;  %v1254_v40 = vadd.f32 %v2572_v56, %v1182_v59  ;;  %v1255_v22 = vadd.f32 %v2586_v38, %v1183_v14  ;;  %v1008_v31 = vsub.f32 %v2670_v15, %v2667_v50  ;;  %v996_v4 = vmul.f32 0.0013020834, %v974_v61  ;;  %v3216_v62 = vld [vmem:[#allocation13_spill] sm:$0xff]  ;;  %v3218_v60 = vld [vmem:[#allocation19_spill] sm:$0xff] }
 0x1f9   : > { %v1186_v18 = vmul.f32 %v2595_v57, %v1114_v5  ;;  %v1187_v27 = vmul.f32 %v2601_v47, %v1115_v37  ;;  %v1009_v25 = vsub.f32 %v2676_v20, %v2674_v46  ;;  %v1256_v33 = vadd.f32 %v2580_v51, %v1184_v21  ;;  %v3217_v5 = vld [vmem:[#allocation16_spill] sm:$0xff]  ;;  %v3219_v59 = vld [vmem:[#allocation31_spill] sm:$0xff] }
 0x1fa   : > { %v1257_v8 = vadd.f32 %v2592_v19, %v1185_v9  ;;  %v1350_v63 = vadd.f32 %v1302_v2, %v1254_v40  ;;  %v1351_v29 = vadd.f32 %v1303_v13, %v1255_v22  ;;  %v1016_v50 = vmax.f32 %v1008_v31, 0.0  ;;  %v3220_v2 = vld [vmem:[#allocation35_spill] sm:$0xff]  ;;  %v3222_v21 = vld [vmem:[#allocation20_spill] sm:$0xff] }
 0x1fb   : > { %v1258_v32 = vadd.f32 %v2598_v10, %v1186_v18  ;;  %v1259_v26 = vadd.f32 %v2606_v3, %v1187_v27  ;;  %v1017_v15 = vmax.f32 %v1009_v25, 0.0  ;;  %v1352_v46 = vadd.f32 %v1304_v45, %v1256_v33  ;;  %v3221_v45 = vld [vmem:[#allocation8_spill] sm:$0xff]  ;;  %v3223_v18 = vld [vmem:[#allocation22_spill] sm:$0xff] }
 0x1fc   : > { %v1353_v20 = vadd.f32 %v1305_v49, %v1257_v8  ;;  %1398 = vst [vmem:[%s2716_s23 + $0xc0] sm:$0xff] %v1350_v63  ;;  %1399 = vst [vmem:[%s2716_s23 + $0xc8] sm:$0xff] %v1351_v29  ;;  %v1024_v35 = vadd.f32 1e-05, %v1016_v50  ;;  %v1004_v6 = vmul.f32 %v2661_v28, %v2661_v28  ;;  %v1005_v39 = vmul.f32 %v3213_v41, %v3213_v41  ;;  %v3224_v49 = vld [vmem:[#allocation21_spill] sm:$0xff]  ;;  %v3226_v31 = vld [vmem:[#allocation36_spill] sm:$0xff] }
 0x1fd   : > { %v1354_v54 = vadd.f32 %v1306_v42, %v1258_v32  ;;  %v1355_v58 = vadd.f32 %v1307_v7, %v1259_v26  ;;  %v1025_v44 = vadd.f32 1e-05, %v1017_v15  ;;  %1400 = vst [vmem:[%s2716_s23 + $0xd0] sm:$0xff] %v1352_v46  ;;  %v997_v16 = vmul.f32 0.0013020834, %v981_v55  ;;  %v3225_v7 = vld [vmem:[#allocation23_spill] sm:$0xff] }
 0x1fe   : > { %1401 = vst [vmem:[%s2716_s23 + $0xd8] sm:$0xff] %v1353_v20  ;;  %1778 = vrsqrt.f32 %v1024_v35  ;;  %v1012_v12 = vsub.f32 %v996_v4, %v1004_v6  ;;  %v1050_v30 = vsub.f32 %v3215_v11, %v3214_v34  ;;  %v1051_v52 = vsub.f32 %v3216_v62, %v3214_v34  ;;  %v3227_v33 = vld [vmem:[#allocation40_spill] sm:$0xff]  ;;  %v3228_v32 = vld [vmem:[#allocation27_spill] sm:$0xff]  ;;  %v3231_v15 = vld [vmem:[#allocation33_spill] sm:$0xff] }
 0x1ff   : > { %1402 = vst [vmem:[%s2716_s23 + $0xe0] sm:$0xff] %v1354_v54  ;;  %1403 = vst [vmem:[%s2716_s23 + $0xe8] sm:$0xff] %v1355_v58  ;;  %1780 = vrsqrt.f32 %v1025_v44  ;;  %v1013_v1 = vsub.f32 %v997_v16, %v1005_v39  ;;  %v1052_v23 = vsub.f32 %v3217_v5, %v3214_v34  ;;  %v1053_v48 = vsub.f32 %v3218_v60, %v3214_v34  ;;  %v3229_v61 = vld [vmem:[#allocation28_spill] sm:$0xff]  ;;  %v3232_v46 = vld [vmem:[#allocation38_spill] sm:$0xff] }
 0x200   : > { %v1020_v36 = vmax.f32 %v1012_v12, 0.0  ;;  %v1054_v14 = vsub.f32 %v3219_v59, %v3214_v34  ;;  %v1055_v13 = vsub.f32 %v3220_v2, %v3214_v34  ;;  %v1056_v9 = vsub.f32 %v3222_v21, %v3221_v45  ;;  %v3230_v29 = vld [vmem:[#allocation32_spill] sm:$0xff]  ;;  %v3233_v54 = vld [vmem:[#allocation41_spill] sm:$0xff]  ;;  %v3235_v6 = vld [vmem:[#allocation30_spill] sm:$0xff] }
 0x201   : > { %v1021_v24 = vmax.f32 %v1013_v1, 0.0  ;;  %v1057_v27 = vsub.f32 %v3223_v18, %v3221_v45  ;;  %v1058_v42 = vsub.f32 %v3224_v49, %v3221_v45  ;;  %v1059_v40 = vsub.f32 %v3225_v7, %v3221_v45  ;;  %v3234_v35 = vld [vmem:[#allocation29_spill] sm:$0xff]  ;;  %v3236_v39 = vld [vmem:[#allocation34_spill] sm:$0xff] }
 0x202   : > { %v1028_v37 = vadd.f32 1e-05, %v1020_v36  ;;  %v1060_v25 = vsub.f32 %v3226_v31, %v3221_v45  ;;  %v1061_v8 = vsub.f32 %v3227_v33, %v3221_v45  ;;  %v1074_v26 = vsub.f32 %v3228_v32, %v2661_v28  ;;  %v3237_v1 = vld [vmem:[#allocation37_spill] sm:$0xff]  ;;  %v3239_v11 = vld [vmem:[#allocation42_spill] sm:$0xff] }
 0x203   : > { %v1029_v22 = vadd.f32 1e-05, %v1021_v24  ;;  %v1075_v63 = vsub.f32 %v3229_v61, %v2661_v28  ;;  %v1076_v50 = vsub.f32 %v3230_v29, %v2661_v28  ;;  %v1077_v55 = vsub.f32 %v3231_v15, %v2661_v28  ;;  %v3238_v24 = vld [vmem:[#allocation39_spill] sm:$0xff]  ;;  %v1290_v7 = vld [vmem:[%s2681_s13 + $0x60] sm:$0xff]  ;;  %v1291_v34 = vld [vmem:[%s2681_s13 + $0x68] sm:$0xff] }
 0x204   : > { %1782 = vrsqrt.f32 %v1028_v37  ;;  %v1078_v20 = vsub.f32 %v3232_v46, %v2661_v28  ;;  %v1079_v58 = vsub.f32 %v3233_v54, %v2661_v28  ;;  %v1080_v44 = vsub.f32 %v3234_v35, %v3213_v41  ;;  %v1315_v46 = vld [vmem:[%s2681_s13 + $0x128] sm:$0xff] }
 0x205   : > { %1784 = vrsqrt.f32 %v1029_v22  ;;  %v3240_v54 = vsub.f32 %v3235_v6, %v3213_v41  ;;  %v3241_v6 = vsub.f32 %v3236_v39, %v3213_v41 }
 0x208   : > { %v1779_v12 = vpop.eup %1778 }
 0x209   : > { %v1781_v5 = vpop.eup %1780  ;;  %v1098_v37 = vmul.f32 %v1779_v12, %v1050_v30  ;;  %v1099_v60 = vmul.f32 %v1779_v12, %v1051_v52  ;;  %v1100_v59 = vmul.f32 %v1779_v12, %v1052_v23  ;;  %v1101_v2 = vmul.f32 %v1779_v12, %v1053_v48  ;;  %v1292_v30 = vld [vmem:[%s2681_s13 + $0x70] sm:$0xff]  ;;  %v1293_v52 = vld [vmem:[%s2681_s13 + $0x78] sm:$0xff] }
 0x20a   : > { %v1102_v45 = vmul.f32 %v1779_v12, %v1054_v14  ;;  %v1103_v21 = vmul.f32 %v1779_v12, %v1055_v13  ;;  %v1104_v18 = vmul.f32 %v1781_v5, %v1056_v9  ;;  %v1105_v49 = vmul.f32 %v1781_v5, %v1057_v27  ;;  %v1294_v9 = vld [vmem:[%s2681_s13 + $0x80] sm:$0xff]  ;;  %v1295_v27 = vld [vmem:[%s2681_s13 + $0x88] sm:$0xff] }
 0x20b   : > { %v1170_v31 = vmul.f32 %v2567_v43, %v1098_v37  ;;  %v1171_v33 = vmul.f32 %v2583_v53, %v1099_v60  ;;  %v1172_v22 = vmul.f32 %v2575_v17, %v1100_v59  ;;  %v1173_v62 = vmul.f32 %v2589_v0, %v1101_v2 }
 0x20c   : > { %v1174_v23 = vmul.f32 %v2595_v57, %v1102_v45  ;;  %v1175_v48 = vmul.f32 %v2601_v47, %v1103_v21  ;;  %v1106_v14 = vmul.f32 %v1781_v5, %v1058_v42  ;;  %v1107_v13 = vmul.f32 %v1781_v5, %v1059_v40 }
 0x20d   : > { %v1242_v12 = vadd.f32 %v2572_v56, %v1170_v31  ;;  %v1243_v37 = vadd.f32 %v2586_v38, %v1171_v33  ;;  %v1244_v60 = vadd.f32 %v2580_v51, %v1172_v22  ;;  %v1245_v59 = vadd.f32 %v2592_v19, %v1173_v62 }
 0x20e   : > { %v1246_v2 = vadd.f32 %v2598_v10, %v1174_v23  ;;  %v1247_v45 = vadd.f32 %v2606_v3, %v1175_v48  ;;  %v1108_v42 = vmul.f32 %v1781_v5, %v1060_v25  ;;  %v1109_v40 = vmul.f32 %v1781_v5, %v1061_v8  ;;  %v1783_v21 = vpop.eup %1782  ;;  %v1296_v25 = vld [vmem:[%s2681_s13 + $0x90] sm:$0xff]  ;;  %v1297_v8 = vld [vmem:[%s2681_s13 + $0x98] sm:$0xff] }
 0x20f   : > { %v1338_v31 = vadd.f32 %v1290_v7, %v1242_v12  ;;  %v1339_v33 = vadd.f32 %v1291_v34, %v1243_v37  ;;  %v1340_v36 = vadd.f32 %v1292_v30, %v1244_v60  ;;  %v1341_v16 = vadd.f32 %v1293_v52, %v1245_v59  ;;  %v1298_v34 = vld [vmem:[%s2681_s13 + $0xa0] sm:$0xff]  ;;  %v1785_v52 = vpop.eup %1784  ;;  %v1300_v48 = vld [vmem:[%s2681_s13 + $0xb0] sm:$0xff] }
 0x210   : > { %v1342_v22 = vadd.f32 %v1294_v9, %v1246_v2  ;;  %v1343_v4 = vadd.f32 %v1295_v27, %v1247_v45  ;;  %v1176_v62 = vmul.f32 %v2567_v43, %v1104_v18  ;;  %v1177_v23 = vmul.f32 %v2583_v53, %v1105_v49  ;;  %v1299_v49 = vld [vmem:[%s2681_s13 + $0xa8] sm:$0xff]  ;;  %v1301_v9 = vld [vmem:[%s2681_s13 + $0xb8] sm:$0xff] }
 0x211   : > { %1386 = vst [vmem:[%s2716_s23 + $0x60] sm:$0xff] %v1338_v31  ;;  %1387 = vst [vmem:[%s2716_s23 + $0x68] sm:$0xff] %v1339_v33  ;;  %v1178_v5 = vmul.f32 %v2575_v17, %v1106_v14  ;;  %v1179_v7 = vmul.f32 %v2589_v0, %v1107_v13  ;;  %v1180_v30 = vmul.f32 %v2595_v57, %v1108_v42  ;;  %v1314_v42 = vld [vmem:[%s2681_s13 + $0x120] sm:$0xff]  ;;  %v1317_v31 = vld [vmem:[%s2681_s13 + $0x138] sm:$0xff] }
 0x212   : > { %1388 = vst [vmem:[%s2716_s23 + $0x70] sm:$0xff] %v1340_v36  ;;  %1389 = vst [vmem:[%s2716_s23 + $0x78] sm:$0xff] %v1341_v16  ;;  %v1181_v18 = vmul.f32 %v2601_v47, %v1109_v40  ;;  %v1248_v36 = vadd.f32 %v2572_v56, %v1176_v62  ;;  %v1249_v16 = vadd.f32 %v2586_v38, %v1177_v23 }
 0x213   : > { %1390 = vst [vmem:[%s2716_s23 + $0x80] sm:$0xff] %v1342_v22  ;;  %1391 = vst [vmem:[%s2716_s23 + $0x88] sm:$0xff] %v1343_v4  ;;  %v1122_v14 = vmul.f32 %v1783_v21, %v1074_v26  ;;  %v1123_v13 = vmul.f32 %v1783_v21, %v1075_v63  ;;  %v1250_v4 = vadd.f32 %v2580_v51, %v1178_v5 }
 0x214   : > { %v1251_v27 = vadd.f32 %v2592_v19, %v1179_v7  ;;  %v1252_v12 = vadd.f32 %v2598_v10, %v1180_v30  ;;  %v1253_v37 = vadd.f32 %v2606_v3, %v1181_v18  ;;  %v1344_v60 = vadd.f32 %v1296_v25, %v1248_v36  ;;  %v1318_v25 = vld [vmem:[%s2681_s13 + $0x140] sm:$0xff] }
 0x215   : > { %v1345_v59 = vadd.f32 %v1297_v8, %v1249_v16  ;;  %v1124_v32 = vmul.f32 %v1783_v21, %v1076_v50  ;;  %v1125_v26 = vmul.f32 %v1783_v21, %v1077_v55  ;;  %v1346_v61 = vadd.f32 %v1298_v34, %v1250_v4  ;;  %v1319_v8 = vld [vmem:[%s2681_s13 + $0x148] sm:$0xff] }
 0x216   : > { %v1347_v63 = vadd.f32 %v1299_v49, %v1251_v27  ;;  %v1348_v2 = vadd.f32 %v1300_v48, %v1252_v12  ;;  %v1349_v45 = vadd.f32 %v1301_v9, %v1253_v37  ;;  %1392 = vst [vmem:[%s2716_s23 + $0x90] sm:$0xff] %v1344_v60  ;;  %v1126_v29 = vmul.f32 %v1783_v21, %v1078_v20 }
 0x217   : > { %1393 = vst [vmem:[%s2716_s23 + $0x98] sm:$0xff] %v1345_v59  ;;  %v1127_v50 = vmul.f32 %v1783_v21, %v1079_v58  ;;  %v1194_v15 = vmul.f32 %v2567_v43, %v1122_v14  ;;  %v1195_v55 = vmul.f32 %v2583_v53, %v1123_v13  ;;  %1394 = vst [vmem:[%s2716_s23 + $0xa0] sm:$0xff] %v1346_v61  ;;  %v1316_v21 = vld [vmem:[%s2681_s13 + $0x130] sm:$0xff] }
 0x218   : > { %1395 = vst [vmem:[%s2716_s23 + $0xa8] sm:$0xff] %v1347_v63  ;;  %1396 = vst [vmem:[%s2716_s23 + $0xb0] sm:$0xff] %v1348_v2  ;;  %v1196_v20 = vmul.f32 %v2575_v17, %v1124_v32  ;;  %v1197_v40 = vmul.f32 %v2589_v0, %v1125_v26  ;;  %v1128_v28 = vmul.f32 %v1785_v52, %v1080_v44  ;;  %v1325_v32 = vld [vmem:[%s2681_s13 + $0x178] sm:$0xff] }
 0x219   : > { %1397 = vst [vmem:[%s2716_s23 + $0xb8] sm:$0xff] %v1349_v45  ;;  %v1129_v58 = vmul.f32 %v1785_v52, %v3240_v54  ;;  %v1198_v33 = vmul.f32 %v2595_v57, %v1126_v29  ;;  %v1199_v22 = vmul.f32 %v2601_v47, %v1127_v50  ;;  %v1266_v62 = vadd.f32 %v2572_v56, %v1194_v15 }
 0x21a   : > { %v1267_v23 = vadd.f32 %v2586_v38, %v1195_v55  ;;  %v1268_v35 = vadd.f32 %v2580_v51, %v1196_v20  ;;  %v1269_v44 = vadd.f32 %v2592_v19, %v1197_v40  ;;  %v1130_v34 = vmul.f32 %v1785_v52, %v3241_v6 }
 0x21b   : > { %v3242_v5 = vsub.f32 %v3237_v1, %v3213_v41  ;;  %v1270_v30 = vadd.f32 %v2598_v10, %v1198_v33  ;;  %v1271_v18 = vadd.f32 %v2606_v3, %v1199_v22  ;;  %v1362_v49 = vadd.f32 %v1314_v42, %v1266_v62 }
 0x21c   : > { %v1363_v48 = vadd.f32 %v1315_v46, %v1267_v23  ;;  %v1364_v39 = vadd.f32 %v1316_v21, %v1268_v35  ;;  %v1365_v9 = vadd.f32 %v1317_v31, %v1269_v44  ;;  %v3243_v1 = vsub.f32 %v3238_v24, %v3213_v41  ;;  %v1320_v24 = vld [vmem:[%s2681_s13 + $0x150] sm:$0xff] }
 0x21d   : > { %v1131_v7 = vmul.f32 %v1785_v52, %v3242_v5  ;;  %v3244_v16 = vsub.f32 %v3239_v11, %v3213_v41  ;;  %v1366_v13 = vadd.f32 %v1318_v25, %v1270_v30  ;;  %v1367_v4 = vadd.f32 %v1319_v8, %v1271_v18  ;;  %1410 = vst [vmem:[%s2716_s23 + $0x120] sm:$0xff] %v1362_v49  ;;  %v1321_v41 = vld [vmem:[%s2681_s13 + $0x158] sm:$0xff]  ;;  %v1322_v11 = vld [vmem:[%s2681_s13 + $0x160] sm:$0xff] }
 0x21e   : > { %v1132_v36 = vmul.f32 %v1785_v52, %v3243_v1  ;;  %1411 = vst [vmem:[%s2716_s23 + $0x128] sm:$0xff] %v1363_v48  ;;  %v1200_v27 = vmul.f32 %v2567_v43, %v1128_v28  ;;  %v1201_v12 = vmul.f32 %v2583_v53, %v1129_v58  ;;  %1412 = vst [vmem:[%s2716_s23 + $0x130] sm:$0xff] %v1364_v39  ;;  %v1323_v43 = vld [vmem:[%s2681_s13 + $0x168] sm:$0xff]  ;;  %v1324_v53 = vld [vmem:[%s2681_s13 + $0x170] sm:$0xff]  ;;  %s1790_s13 = sshll.u32 %s1883_s10, 4  ;;  %s1791_s13 = int_to_ptr.vmem [resolvable:$false] %s1790_s13 }
 0x21f   : > { %v1133_v14 = vmul.f32 %v1785_v52, %v3244_v16  ;;  %1413 = vst [vmem:[%s2716_s23 + $0x138] sm:$0xff] %v1365_v9  ;;  %v1202_v52 = vmul.f32 %v2575_v17, %v1130_v34  ;;  %v1203_v37 = vmul.f32 %v2589_v0, %v1131_v7  ;;  %1414 = vst [vmem:[%s2716_s23 + $0x140] sm:$0xff] %v1366_v13  ;;  %s1792_s14 = scalar_lea.vmem %s1791_s13, 12288  ;;  %p1793_p4 = scmp.lt.s32.totalorder %s3017_s30, %s1791_s13 }
 0x220   : > { %v1204_v60 = vmul.f32 %v2595_v57, %v1132_v36  ;;  %1415 = vst [vmem:[%s2716_s23 + $0x148] sm:$0xff] %v1367_v4  ;;  %v1272_v26 = vadd.f32 %v2572_v56, %v1200_v27  ;;  %v1273_v17 = vadd.f32 %v2586_v38, %v1201_v12  ;;  %p1794_p5 = scmp.lt.s32.totalorder %s1792_s14, %s1786_s9 }
 0x221   : > { %v1205_v59 = vmul.f32 %v2601_v47, %v1133_v14  ;;  %v1274_v0 = vadd.f32 %v2580_v51, %v1202_v52  ;;  %v1275_v57 = vadd.f32 %v2592_v19, %v1203_v37 }
 0x222   : > { %v1276_v47 = vadd.f32 %v2598_v10, %v1204_v60  ;;  %v1368_v63 = vadd.f32 %v1320_v24, %v1272_v26  ;;  %v1369_v2 = vadd.f32 %v1321_v41, %v1273_v17  ;;  %p1795_p6 = por %p1794_p5, %p1793_p4 }
 0x223   : > { %v1277_v61 = vadd.f32 %v2606_v3, %v1205_v59  ;;  %v1370_v56 = vadd.f32 %v1322_v11, %v1274_v0  ;;  %v1371_v51 = vadd.f32 %v1323_v43, %v1275_v57 }
 0x224   : > { %v1372_v38 = vadd.f32 %v1324_v53, %v1276_v47  ;;  %1416 = vst [vmem:[%s2716_s23 + $0x150] sm:$0xff] %v1368_v63  ;;  %1417 = vst [vmem:[%s2716_s23 + $0x158] sm:$0xff] %v1369_v2  ;;  %p1796_p7 = pnand %p1795_p6, %p1789_p2 }
 0x225   : > { %v1373_v19 = vadd.f32 %v1325_v32, %v1277_v61  ;;  %1418 = vst [vmem:[%s2716_s23 + $0x160] sm:$0xff] %v1370_v56  ;;  %1419 = vst [vmem:[%s2716_s23 + $0x168] sm:$0xff] %v1371_v51 }
 0x226   : > { %1420 = vst [vmem:[%s2716_s23 + $0x170] sm:$0xff] %v1372_v38 }
 0x227   : > { %1421 = vst [vmem:[%s2716_s23 + $0x178] sm:$0xff] %v1373_v19 }
 0x228   : > { %1799 = shalt.err (!%p1796_p7)
}
 0x229   : > { %s1800_s12 = scalar_lea.hbm %s3015_s8, 6144  ;;  %s1804_s24 = scalar_lea.hbm %s3083_s4, 24576 }
 0x22a   : > { %p1801_p9 = scmp.ne.s32.totalorder %s3015_s8, %s1800_s12  ;;  %p1805_p12 = scmp.lt.u32.totalorder %s3015_s8, %s3083_s4 }
 0x22b   : > { %p1806_p13 = scmp.lt.u32.totalorder %s1804_s24, %s1800_s12  ;;  %p1808_p1 = scmp.lt.u32.totalorder %s1800_s12, %s3015_s8 }
 0x22c   : > { %p1802_p10 = pnand %p1801_p9, %p1962_p3 }
 0x22d   : > { %p1807_p0 = por %p1806_p13, %p1805_p12 }
 0x22e   : > { %p1803_p11 = pneg %p1802_p10 }
 0x22f   : > { %p1809_p2 = por %p1808_p1, %p1807_p0 }
 0x231   : > { %p1810_p4 = pnand %p1809_p2, %p1803_p11 }
 0x233   : > { %1813 = shalt.err (!%p1810_p4)
}
 0x234   : > { %s1884_s5 = smov 768   ;;  %s1885_s11 = smov 48  }
 0x235   : > { %1620 = dma.vmem_to_hbm [thread:$0]  (%p1962_p3), %s3017_s30, 6144, %s3015_s8, %s3027_s6, %s1884_s5, %s1884_s5, %s1885_s11  }
 0x236 PF: > { %p1626_p5 = scmp.ge.s32.totalorder %s1880_s22, 2  ;;  %s1454_s9 = sand.u32 1, %s1852_s15  }
 0x237   : > { %s1455_s10 = scalar_lea.sflag [#allocation3], %s1454_s9 }
 0x238   : > { %p1623_p6 = pnand %p1626_p5, %p1971_p8 }
 0x23a   : > { %1847 = dma.done.wait (!%p1623_p6), %s1455_s10, 6144  }
 0x23b   : > { %1849 = vsyncadd (!%p1623_p6), %s1455_s10, 4294961152  ;;  %s17_s22 = sadd.s32 1, %s1880_s22   ;;  %s3245_s15 = smov %s1856_s16 }
 0x23c   : > { %p14_p7 = scmp.ge.s32.totalorder %s17_s22, 6   ;;  %s3246_s16 = smov %s1860_s17 }
 0x23d   : > { %s3247_s17 = smov %s1980_s7  ;;  %s3248_s18 = smov %s1872_s20 }
 0x23e   : > { %s3249_s19 = smov %s1876_s21  ;;  %s3250_s20 = smov %s3253_s25 }
 0x23f   : > { %s3251_s21 = smov %s3257_s26  ;;  %16 = sbr.rel (!%p14_p7) target bundleno = 5 (0x5), region = 74 }
 0x246   :  { %1460 = vsyncpa [#allocation3], 1 }
 0x247   :  { %1462 = vsyncpa [#allocation3 + $0x1], 1 }

</bundles_post_ra>
